<compile_context>
chip_gen: v5e
topology: v5e:2x2
jax: 0.10.0
libtpu: 0.0.40
codegen_flags: <defaults>
</compile_context>

<pallas_src>
import functools
import math

import jax
import jax.numpy as jnp
from jax.experimental import pallas as pl
from jax.experimental.pallas import tpu as pltpu

_GOLDEN = 0x9E3779B9  # splitmix32 golden-ratio constant (fallback path only)


def _dropout_add_kernel(seed_ref, x_ref, y_ref, o_ref, *,
                        keep_threshold24, scale, apply_dropout, drop_all,
                        use_hw_prng):
    """out = dropout(x, p) + y on one (block_rows, H) tile (inverted dropout)."""
    x = x_ref[...]
    y = y_ref[...]

    if not apply_dropout:
        # Eval mode or p == 0: identity + residual add.
        o_ref[...] = (x + y).astype(o_ref.dtype)
        return
    if drop_all:
        # p >= 1: every element of x is dropped.
        o_ref[...] = y.astype(o_ref.dtype)
        return

    block_rows, H = x.shape
    blk = pl.program_id(0)

    if use_hw_prng:
        # Hardware PRNG fills vregs on its own path (no VALU hash work).
        # Re-seed per (seed, block) so every grid step / core draws an
        # independent, order-independent stream.
        pltpu.prng_seed(seed_ref[0], blk)
        bits = pltpu.prng_random_bits((block_rows, H))
        if bits.dtype != jnp.uint32:
            bits = pltpu.bitcast(bits, jnp.uint32)
    else:
        # Fallback (interpret mode / CPU): stateless splitmix32-style hash of
        # (seed, global element index) on the VPU.
        row = jax.lax.broadcasted_iota(jnp.int32, (block_rows, H), 0)
        col = jax.lax.broadcasted_iota(jnp.int32, (block_rows, H), 1)
        base = blk * (block_rows * H)                    # scalar
        ctr = (base + row * H + col).astype(jnp.uint32)
        # Scalar seed mix stays on the scalar unit; only the add broadcasts.
        offset = seed_ref[0].astype(jnp.uint32) * jnp.uint32(_GOLDEN)
        h = ctr + offset
        h = h ^ (h >> 16)
        h = h * jnp.uint32(0x7FEB352D)
        h = h ^ (h >> 15)
        h = h * jnp.uint32(0x846CA68B)
        h = h ^ (h >> 16)
        bits = h

    # Compare only the top 24 bits: both operands are < 2^31, so the result
    # is identical under signed or unsigned compare lowering.
    keep = (bits >> 8) < jnp.uint32(keep_threshold24)
    # Fused dropout + residual add: where(keep, x*scale + y, y).
    o_ref[...] = jnp.where(
        keep, x * jnp.asarray(scale, x.dtype) + y, y
    ).astype(o_ref.dtype)


def dropout_add(x, y, *, p=0.1, seed=0, training=True, row_blocks=None,
                use_hw_prng=None):
    """Pallas TPU implementation of Dropout(p)(x) + y for (..., H) inputs.

    NOTE: the mask is a deterministic function of (seed, element index);
    callers must thread a fresh seed per forward call (like torch drawing a
    fresh mask every invocation).
    """
    assert x.shape == y.shape and x.dtype == y.dtype
    orig_shape = x.shape
    H = int(orig_shape[-1])
    R = int(math.prod(orig_shape[:-1]))  # fold batch/seq into the row dim

    x2 = x.reshape(R, H)
    y2 = y.reshape(R, H)
    seed_arr = jnp.asarray([seed], dtype=jnp.int32)

    keep_prob = 1.0 - float(p)
    apply_dropout = bool(training) and float(p) > 0.0
    drop_all = float(p) >= 1.0
    if apply_dropout and not drop_all:
        # keep iff top-24 random bits < round(keep_prob * 2^24).
        keep_threshold24 = min(int(round(keep_prob * 2.0 ** 24)), 2 ** 24 - 1)
        keep_threshold24 = max(keep_threshold24, 1)
        scale = 1.0 / keep_prob
    else:
        keep_threshold24 = 0
        scale = 1.0

    if use_hw_prng is None:
        # pltpu.prng_* only lowers on real TPUs; use the hash anywhere else.
        use_hw_prng = jax.default_backend() == "tpu"

    # Row tiling: >=2 blocks so (a) v7x can shard the "parallel" grid axis
    # across both TensorCores and (b) v5e/v6e overlap DMA with compute via
    # BlockSpec double-buffering.  Blocks keep (8, 128) alignment; fall back
    # to a single block if the shape does not split cleanly.
    if row_blocks is None:
        row_blocks = 2
    if row_blocks < 1 or R % row_blocks != 0 or (R // row_blocks) % 8 != 0:
        row_blocks = 1
    block_rows = R // row_blocks

    kernel = functools.partial(
        _dropout_add_kernel,
        keep_threshold24=keep_threshold24,   # Python constants baked at trace
        scale=scale,
        apply_dropout=apply_dropout,
        drop_all=drop_all,
        use_hw_prng=use_hw_prng,
    )

    out2 = pl.pallas_call(
        kernel,
        out_shape=jax.ShapeDtypeStruct((R, H), x.dtype),
        grid=(row_blocks,),
        in_specs=[
            # Runtime seed scalar, untiled, placed in SMEM (no scalar-prefetch
            # plumbing needed).
            pl.BlockSpec(memory_space=pltpu.MemorySpace.SMEM),
            pl.BlockSpec((block_rows, H), lambda i: (i, 0)),
            pl.BlockSpec((block_rows, H), lambda i: (i, 0)),
        ],
        out_specs=pl.BlockSpec((block_rows, H), lambda i: (i, 0)),
        compiler_params=pltpu.CompilerParams(
            # Blocks are fully independent (per-block re-seed) -> 'parallel'
            # lets Mosaic shard the row axis across both TCs on v7x.
            dimension_semantics=("parallel",),
        ),
    )(seed_arr, x2, y2)

    return out2.reshape(orig_shape)


if __name__ == "__main__":
    key = jax.random.PRNGKey(0)
    k1, k2 = jax.random.split(key)
    # Shapes from the PyTorch module: x278, x275 are (1, 384, 256).
    x278 = jax.random.normal(k1, (1, 384, 256), dtype=jnp.float32)
    x275 = jax.random.normal(k2, (1, 384, 256), dtype=jnp.float32)

    # Training path (dropout active).
    out = dropout_add(x278, x275, p=0.1, seed=1234, training=True)
    jax.block_until_ready(out)
    assert out.shape == (1, 384, 256) and out.dtype == jnp.float32

    # Eval path: identity + add.
    out_eval = dropout_add(x278, x275, p=0.1, training=False)
    jax.block_until_ready(out_eval)
    assert jnp.allclose(out_eval, x278 + x275, atol=1e-6)

    # Training semantics: every element is either x/keep_prob + y (kept) or
    # y (dropped), and the keep fraction is close to keep_prob = 0.9.
    keep_prob = 0.9
    expect_keep = x278 / keep_prob + x275
    is_keep = jnp.isclose(out, expect_keep, atol=1e-5)
    is_drop = jnp.isclose(out, x275, atol=1e-6)
    assert bool(jnp.all(is_keep | is_drop))
    frac_kept = float(jnp.mean(is_keep.astype(jnp.float32)))
    assert 0.8 < frac_kept < 0.97, frac_kept

    # Fresh masks: a different seed must produce a different mask (callers
    # thread a new seed each forward pass).
    out2 = dropout_add(x278, x275, p=0.1, seed=5678, training=True)
    jax.block_until_ready(out2)
    assert not bool(jnp.all(jnp.isclose(out, out2, atol=1e-6)))

    print("KERNEL_OK")
</pallas_src>

<mosaic_0001>
module attributes {stable_mosaic.version = 11 : i64} {
  func.func @_dropout_add_kernel(%arg0: i32, %arg1: memref<1xi32, #tpu.memory_space<smem>>, %arg2: memref<192x256xf32, #tpu.memory_space<vmem>>, %arg3: memref<192x256xf32, #tpu.memory_space<vmem>>, %arg4: memref<192x256xf32, #tpu.memory_space<vmem>>) attributes {dimension_semantics = [#tpu.dimension_semantics<parallel>], iteration_bounds = array<i64: 2>, scalar_prefetch = 0 : i64, scratch_operands = 0 : i64, tpu.core_type = #tpu.core_type<tc>, window_params = [{transform_indices = @transform_0, window_bounds = array<i64: 1>}, {transform_indices = @transform_1, window_bounds = array<i64: 192, 256>}, {transform_indices = @transform_2, window_bounds = array<i64: 192, 256>}, {transform_indices = @transform_3, window_bounds = array<i64: 192, 256>}]} {
    %c0 = arith.constant 0 : index
    %c0_0 = arith.constant 0 : index
    %0 = vector.load %arg2[%c0, %c0_0] : memref<192x256xf32, #tpu.memory_space<vmem>>, vector<192x256xf32>
    %c0_1 = arith.constant 0 : index
    %c0_2 = arith.constant 0 : index
    %1 = vector.load %arg3[%c0_1, %c0_2] : memref<192x256xf32, #tpu.memory_space<vmem>>, vector<192x256xf32>
    %2 = tpu.iota {dimensions = array<i32: 0>} : vector<192x256xi32>
    %3 = tpu.iota {dimensions = array<i32: 1>} : vector<192x256xi32>
    %c49152_i32 = arith.constant 49152 : i32
    %4 = arith.muli %arg0, %c49152_i32 : i32
    %c256_i32 = arith.constant 256 : i32
    %5 = vector.broadcast %c256_i32 : i32 to vector<192x256xi32>
    %6 = arith.muli %2, %5 : vector<192x256xi32>
    %7 = vector.broadcast %4 : i32 to vector<192x256xi32>
    %8 = arith.addi %7, %6 : vector<192x256xi32>
    %9 = arith.addi %8, %3 : vector<192x256xi32>
    %c0_3 = arith.constant 0 : index
    %10 = memref.load %arg1[%c0_3] : memref<1xi32, #tpu.memory_space<smem>>
    %c-1640531527_i32 = arith.constant -1640531527 : i32
    %11 = arith.muli %10, %c-1640531527_i32 : i32
    %12 = vector.broadcast %11 : i32 to vector<192x256xi32>
    %13 = arith.addi %9, %12 : vector<192x256xi32>
    %c16_i32 = arith.constant 16 : i32
    %14 = vector.broadcast %c16_i32 : i32 to vector<192x256xi32>
    %15 = arith.shrui %13, %14 : vector<192x256xi32>
    %16 = arith.xori %13, %15 : vector<192x256xi32>
    %c2146121005_i32 = arith.constant 2146121005 : i32
    %17 = vector.broadcast %c2146121005_i32 : i32 to vector<192x256xi32>
    %18 = arith.muli %16, %17 : vector<192x256xi32>
    %c15_i32 = arith.constant 15 : i32
    %19 = vector.broadcast %c15_i32 : i32 to vector<192x256xi32>
    %20 = arith.shrui %18, %19 : vector<192x256xi32>
    %21 = arith.xori %18, %20 : vector<192x256xi32>
    %c-2073254261_i32 = arith.constant -2073254261 : i32
    %22 = vector.broadcast %c-2073254261_i32 : i32 to vector<192x256xi32>
    %23 = arith.muli %21, %22 : vector<192x256xi32>
    %c16_i32_4 = arith.constant 16 : i32
    %24 = vector.broadcast %c16_i32_4 : i32 to vector<192x256xi32>
    %25 = arith.shrui %23, %24 : vector<192x256xi32>
    %26 = arith.xori %23, %25 : vector<192x256xi32>
    %c8_i32 = arith.constant 8 : i32
    %27 = vector.broadcast %c8_i32 : i32 to vector<192x256xi32>
    %28 = arith.shrui %26, %27 : vector<192x256xi32>
    %c15099494_i32 = arith.constant 15099494 : i32
    %29 = vector.broadcast %c15099494_i32 : i32 to vector<192x256xi32>
    %30 = arith.cmpi ult, %28, %29 : vector<192x256xi32>
    %cst = arith.constant 1.11111116 : f32
    %31 = vector.broadcast %cst : f32 to vector<192x256xf32>
    %32 = arith.mulf %0, %31 : vector<192x256xf32>
    %33 = arith.addf %32, %1 : vector<192x256xf32>
    %34 = arith.select %30, %33, %1 : vector<192x256xi1>, vector<192x256xf32>
    %c0_5 = arith.constant 0 : index
    %c0_6 = arith.constant 0 : index
    %35 = vector.load %arg4[%c0_5, %c0_6] : memref<192x256xf32, #tpu.memory_space<vmem>>, vector<192x256xf32>
    tpu.vector_store %arg4[%c0_5, %c0_6], %34 {strides = array<i32>} : memref<192x256xf32, #tpu.memory_space<vmem>>, vector<192x256xf32>,
    return
  }
  func.func @transform_0(%arg0: i32) -> i32 {
    %c0_i32 = arith.constant 0 : i32
    %c0_i32_0 = arith.constant 0 : i32
    return %c0_i32 : i32
  }
  func.func @transform_1(%arg0: i32) -> (i32, i32) {
    %c0_i32 = arith.constant 0 : i32
    %c0_i32_0 = arith.constant 0 : i32
    return %arg0, %c0_i32 : i32, i32
  }
  func.func @transform_2(%arg0: i32) -> (i32, i32) {
    %c0_i32 = arith.constant 0 : i32
    %c0_i32_0 = arith.constant 0 : i32
    return %arg0, %c0_i32 : i32, i32
  }
  func.func @transform_3(%arg0: i32) -> (i32, i32) {
    %c0_i32 = arith.constant 0 : i32
    %c0_i32_0 = arith.constant 0 : i32
    return %arg0, %c0_i32 : i32, i32
  }
}

</mosaic_0001>

<bundles_post_ra>
// kernel: tpu_custom_call.1
= control target key start
LH: loop header
LB: loop body
LE: loop exit
PB: predicated region body
PF: predicated region fallthrough
CT: control target
= control target key end

     0   :  { %s2251_s0 = inlined_call_operand.<no memory space> [shape: s32[1], index: 0, kind: input, shape index: {}]   ;;  %s2252_s1 = inlined_call_operand.hbm [shape: f32[384,256], index: 1, kind: input, shape index: {}]   ;;  %s2253_s2 = inlined_call_operand.hbm [shape: f32[384,256], index: 2, kind: input, shape index: {}]   ;;  %s2254_s3 = inlined_call_operand.hbm [shape: f32[384,256], index: 3, kind: output, shape index: {}]  }
   0x1   :  { %8 = sst [smem:[#allocation2]] %s2251_s0 }
   0x2   :  { %9 = vsyncpa [#allocation4], 0 }
   0x3   :  { %11 = vsyncpa [#allocation4 + $0x1], 0 }
   0x4   :  { %12 = vsyncpa [#allocation7], 0 }
   0x5   :  { %14 = vsyncpa [#allocation7 + $0x1], 0 }
   0x6   :  { %15 = vsyncpa [#allocation5], 0 }
   0x7   :  { %17 = vsyncpa [#allocation5 + $0x1], 0  ;;  %s1679_s14 = smov 0   ;;  %s1681_s15 = smov 0  }
   0x8   :  { %s1683_s16 = smov 0   ;;  %s1685_s17 = smov 0  }
   0x9 LB: > { %s1700_s0 = sadd.s32 4294967295, %s1650_s17   ;;  %s1393_s18 = sadd.s32 4294967294, %s1650_s17   ;;  %s1650_s17 = sphi %s1685_s17, %s2263_s17   ;;  %s1646_s16 = sphi %s1683_s16, %s2262_s16   ;;  %s1642_s15 = sphi %s1681_s15, %s2261_s15   ;;  %s1638_s14 = sphi %s1679_s14, %s2260_s14  }
   0xa   : > { %s1704_s19 = sadd.s32 1, %s1650_s17   ;;  %s51_s20 = sadd.s32 1, %s1646_s16 }
   0xb   : > { %s48_s21 = ssub.s32 %s1650_s17, %s1704_s19  ;;  %p58_p0 = scmp.ne.s32.totalorder %s1646_s16, %s1642_s15 }
   0xc   : > { %p49_p1 = scmp.eq.s32.totalorder %s48_s21, 0  ;;  %p59_p2 = scmp.eq.s32.totalorder %s1650_s17, 0 }
   0xd   : > { %p64_p3 = scmp.ne.s32.totalorder %s1642_s15, %s1638_s14  ;;  %p65_p4 = scmp.eq.s32.totalorder %s1700_s0, 0 }
   0xe   : > { %s1716_s22 = scalar_select %p49_p1, %s1646_s16, %s51_s20  }
   0xf   : > { %p60_p5 = por %p59_p2, %p58_p0  ;;  %p1718_p6 = por %p65_p4, %p64_p3 }
  0x10   : > { %p114_p7 = scmp.eq.s32.totalorder %s1700_s0, 1  ;;  %p120_p8 = scmp.eq.s32.totalorder %s1393_s18, 1 }
  0x11   : > { %p1395_p9 = scmp.ge.s32.totalorder %s1650_s17, 2  ;;  %p1482_p10 = scmp.lt.s32.totalorder %s1650_s17, 2 }
  0x12   : > { %p1725_p11 = por %p114_p7, %p58_p0  ;;  %p1729_p12 = por %p120_p8, %p64_p3 }
  0x13   : > { %s1734_s26 = sand.u32 1, %s1646_s16   ;;  %s1459_s27 = smul.u32 384, %s1650_s17 }
  0x14   : > { %s1462_s28 = smul.u32 384, %s1734_s26  ;;  %p1743_p13 = pnand %p1482_p10, %p60_p5 }
  0x15   : > { %s153_s4 = scalar_lea.hbm %s2252_s1, %s1459_s27  ;;  %s144_s9 = scalar_lea.sflag [#allocation4], %s1734_s26 }
  0x16   : > { %s154_s6 = sshll.u32 %s153_s4, 4  ;;  %s147_s7 = scalar_lea.vmem [#allocation3], %s1462_s28  ;;  %s155_s6 = int_to_ptr.hbm [resolvable:$true] %s154_s6 }
  0x17   : > { %s156_s8 = sshll.u32 %s147_s7, 4  ;;  %s1520_s10 = sshra.s32 %s155_s6, 4  ;;  %s157_s8 = int_to_ptr.vmem [resolvable:$true] %s156_s8  ;;  %s1521_s10 = int_to_ptr.hbm [resolvable:$true] %s1520_s10 }
  0x18   : > { %s1522_s11 = scalar_lea.hbm %s1521_s10, 384  ;;  %p1524_p1 = pneg %p1743_p13 }
  0x19   : > { %p1523_p0 = scmp.ne.s32.totalorder %s1521_s10, %s1522_s11  ;;  %s1527_s18 = scalar_lea.hbm %s2252_s1, 768 }
  0x1a   : > { %p1528_p4 = scmp.lt.s32.totalorder %s1521_s10, %s2252_s1  ;;  %p1529_p5 = scmp.lt.s32.totalorder %s1527_s18, %s1522_s11 }
  0x1b   : > { %p1525_p2 = pnand %p1524_p1, %p1523_p0 }
  0x1c   : > { %p1530_p7 = por %p1529_p5, %p1528_p4 }
  0x1d   : > { %p1526_p3 = pneg %p1525_p2 }
  0x1f   : > { %p1531_p8 = pnand %p1530_p7, %p1526_p3 }
  0x21   : > { %1534 = shalt.err (!%p1531_p8)
}
  0x22   : > { %s1652_s29 = smov 256   ;;  %s1653_s30 = smov 16  }
  0x23   : > { %1474 = dma.hbm_to_vmem [thread:$0]  (!%p1743_p13), %s155_s6, 6144, %s157_s8, %s144_s9, %s1652_s29, %s1652_s29, %s1653_s30  }
  0x24   : > { %p1400_p10 = scmp.ge.s32.totalorder %s1650_s17, 1  ;;  %p187_p0 = scmp.lt.s32.totalorder %s1650_s17, 3 }
  0x25   : > { %s176_s11 = scalar_lea.hbm %s2253_s2, %s1459_s27  ;;  %s170_s13 = scalar_lea.vmem [#allocation6], %s1462_s28 }
  0x26   : > { %p1765_p2 = pnand %p1400_p10, %p187_p0  ;;  %s177_s12 = sshll.u32 %s176_s11, 4  ;;  %s178_s12 = int_to_ptr.hbm [resolvable:$true] %s177_s12 }
  0x27   : > { %s179_s18 = sshll.u32 %s170_s13, 4  ;;  %s167_s20 = scalar_lea.sflag [#allocation7], %s1734_s26  ;;  %s180_s18 = int_to_ptr.vmem [resolvable:$true] %s179_s18 }
  0x28   : > { %s1550_s21 = sshra.s32 %s178_s12, 4  ;;  %s1557_s7 = scalar_lea.hbm %s2253_s2, 768  ;;  %s1551_s21 = int_to_ptr.hbm [resolvable:$true] %s1550_s21 }
  0x29   : > { %s1552_s6 = scalar_lea.hbm %s1551_s21, 384  ;;  %p1558_p7 = scmp.lt.s32.totalorder %s1551_s21, %s2253_s2 }
  0x2a   : > { %p1553_p3 = scmp.ne.s32.totalorder %s1551_s21, %s1552_s6  ;;  %p1559_p8 = scmp.lt.s32.totalorder %s1557_s7, %s1552_s6 }
  0x2c   : > { %p1555_p4 = pnand %p1553_p3, %p1524_p1  ;;  %p1560_p10 = por %p1559_p8, %p1558_p7 }
  0x2e   : > { %p1556_p5 = pneg %p1555_p4 }
  0x30   : > { %p1561_p0 = pnand %p1560_p10, %p1556_p5 }
  0x32   : > { %1564 = shalt.err (!%p1561_p0)
}
  0x33   : > { %1477 = dma.hbm_to_vmem [thread:$0]  (!%p1743_p13), %s178_s12, 6144, %s180_s18, %s167_s20, %s1652_s29, %s1652_s29, %s1653_s30  }
  0x34   : > { %191 = sbr.rel (%p1765_p2) target bundleno = 289 (0x121), region = 32  ;;  %s1791_s26 = sand.u32 (!%p1765_p2), 1, %s1642_s15  }
  0x35   : > { %s1794_s28 = smul.u32 (!%p1765_p2), 384, %s1791_s26  ;;  %s194_s11 = scalar_lea.sflag (!%p1765_p2), [#allocation4], %s1791_s26 }
  0x37   : > { %s1798_s13 = scalar_lea.vmem (!%p1765_p2), [#allocation3], %s1794_s28 }
  0x39   : > { %1625 = dma.done.wait (%p1718_p6), %s194_s11, 6144  }
  0x3a   : > { %1627 = vsyncadd (%p1718_p6), %s194_s11, 4294961152  ;;  %s204_s5 = scalar_lea.sflag [#allocation7], %s1791_s26  ;;  %s1806_s29 = scalar_lea.vmem [#allocation6], %s1794_s28 }
  0x3b   : > { %1629 = dma.done.wait (%p1718_p6), %s204_s5, 6144  }
  0x3c   : > { %1631 = vsyncadd (%p1718_p6), %s204_s5, 4294961152  ;;  %v335_v0 = vlaneseq  ;;  %s363_s30 = smul.u32 49152, %s1700_s0  ;;  %s461_s4 = sld [smem:[#allocation2]]  ;;  %v239_v11 = vld [vmem:[%s1798_s13] sm:$0xff]  ;;  %v240_v12 = vld [vmem:[%s1798_s13 + $0x8] sm:$0xff] }
  0x3d   : > { %v1830_v14 = vld [vmem:[%s1806_s29] sm:$0xff]  ;;  %v1088_v16 = vmul.f32 1.1111112, %v239_v11  ;;  %v1089_v18 = vmul.f32 1.1111112, %v240_v12  ;;  %v241_v19 = vld [vmem:[%s1798_s13 + $0x10] sm:$0xff] }
  0x3e   : > { %v1813_v1 = vshrl.u32 %v335_v0, 7  ;;  %v1815_v2 = vand.u32 127, %v335_v0  ;;  %v1817_v3 = vstv %s363_s30  ;;  %v1838_v21 = vld [vmem:[%s1806_s29 + $0x8] sm:$0xff]  ;;  %v1090_v27 = vmul.f32 1.1111112, %v241_v19  ;;  %v242_v28 = vld [vmem:[%s1798_s13 + $0x18] sm:$0xff] }
  0x3f   : > { %v1852_v30 = vadd.f32 %v1088_v16, %v1830_v14  ;;  %v1855_v31 = vld [vmem:[%s1806_s29 + $0x10] sm:$0xff]  ;;  %v1860_v37 = vadd.f32 %v1089_v18, %v1838_v21  ;;  %v243_v38 = vld [vmem:[%s1798_s13 + $0x20] sm:$0xff]  ;;  %v1091_v42 = vmul.f32 1.1111112, %v242_v28  ;;  %v1871_v47 = vld [vmem:[%s1806_s29 + $0x18] sm:$0xff]  ;;  %s1897_s12 = scalar_lea.vmem [#allocation8], %s1794_s28 }
  0x40   : > { %v364_v4 = vmul.u32 256, %v1813_v1  ;;  %v1821_v5 = vadd.s32 128, %v1815_v2  ;;  %v337_v6 = vadd.s32 8, %v1813_v1  ;;  %v338_v7 = vadd.s32 16, %v1813_v1  ;;  %v1876_v55 = vld [vmem:[%s1806_s29 + $0x20] sm:$0xff]  ;;  %s1461_s18 = smul.u32 384, %s1700_s0 }
  0x41   : > { %v339_v13 = vadd.s32 24, %v1813_v1  ;;  %v1843_v24 = vadd.s32 32, %v1813_v1  ;;  %v1849_v29 = vadd.s32 40, %v1813_v1  ;;  %v1868_v46 = vadd.f32 %v1090_v27, %v1855_v31  ;;  %s1294_s0 = sshll.u32 %s1897_s12, 4  ;;  %s1281_s9 = scalar_lea.sflag [#allocation5], %s1791_s26  ;;  %s1295_s0 = int_to_ptr.vmem [resolvable:$true] %s1294_s0 }
  0x42   : > { %v389_v8 = vadd.s32 %v1817_v3, %v364_v4  ;;  %v365_v9 = vmul.u32 256, %v337_v6  ;;  %v366_v10 = vmul.u32 256, %v338_v7  ;;  %s462_s23 = smul.u32 2654435769, %s461_s4  ;;  %v1092_v51 = vmul.f32 1.1111112, %v243_v38  ;;  %s1293_s6 = scalar_lea.hbm %s2254_s3, %s1461_s18 }
  0x43   : > { %v367_v34 = vmul.u32 256, %v339_v13  ;;  %v1880_v60 = vadd.f32 %v1091_v42, %v1871_v47  ;;  %v244_v4 = vld [vmem:[%s1798_s13 + $0x28] sm:$0xff]  ;;  %s1296_s8 = sshll.u32 %s1293_s6, 4  ;;  %s1600_s11 = scalar_lea.hbm %s2254_s3, 768  ;;  %s1297_s8 = int_to_ptr.hbm [resolvable:$true] %s1296_s8 }
  0x44   : > { %v413_v15 = vadd.s32 %v389_v8, %v1815_v2  ;;  %v414_v17 = vadd.s32 %v389_v8, %v1821_v5  ;;  %v1835_v20 = vstv %s462_s23  ;;  %v390_v22 = vadd.s32 %v1817_v3, %v365_v9  ;;  %s1594_s7 = sshra.s32 %s1297_s8, 4  ;;  %s1595_s7 = int_to_ptr.hbm [resolvable:$true] %s1594_s7 }
  0x45   : > { %v391_v23 = vadd.s32 %v1817_v3, %v366_v10  ;;  %v392_v57 = vadd.s32 %v1817_v3, %v367_v34  ;;  %v1885_v9 = vadd.f32 %v1092_v51, %v1876_v55  ;;  %v1093_v19 = vmul.f32 1.1111112, %v244_v4  ;;  %s1596_s27 = scalar_lea.hbm %s1595_s7, 384  ;;  %p1601_p2 = scmp.lt.s32.totalorder %s1595_s7, %s2254_s3 }
  0x46   : > { %v464_v25 = vadd.s32 %v1835_v20, %v413_v15  ;;  %v465_v26 = vadd.s32 %v1835_v20, %v414_v17  ;;  %v415_v32 = vadd.s32 %v390_v22, %v1815_v2  ;;  %v416_v33 = vadd.s32 %v390_v22, %v1821_v5  ;;  %p1597_p6 = scmp.ne.s32.totalorder %s1595_s7, %s1596_s27  ;;  %p1602_p3 = scmp.lt.s32.totalorder %s1600_s11, %s1596_s27 }
  0x47   : > { %v417_v39 = vadd.s32 %v391_v23, %v1815_v2  ;;  %v418_v43 = vadd.s32 %v391_v23, %v1821_v5  ;;  %v419_v6 = vadd.s32 %v392_v57, %v1815_v2 }
  0x48   : > { %v512_v35 = vshrl.u32 %v464_v25, 16  ;;  %v513_v36 = vshrl.u32 %v465_v26, 16  ;;  %v466_v40 = vadd.s32 %v1835_v20, %v415_v32  ;;  %v467_v41 = vadd.s32 %v1835_v20, %v416_v33  ;;  %p1598_p13 = pnand %p1597_p6, %p1725_p11  ;;  %p1603_p4 = por %p1602_p3, %p1601_p2 }
  0x49   : > { %v468_v48 = vadd.s32 %v1835_v20, %v417_v39  ;;  %v469_v52 = vadd.s32 %v1835_v20, %v418_v43  ;;  %v470_v15 = vadd.s32 %v1835_v20, %v419_v6  ;;  %v420_v33 = vadd.s32 %v392_v57, %v1821_v5 }
  0x4a   : > { %v560_v44 = vxor.u32 %v512_v35, %v464_v25  ;;  %v561_v45 = vxor.u32 %v513_v36, %v465_v26  ;;  %v514_v49 = vshrl.u32 %v466_v40, 16  ;;  %v515_v50 = vshrl.u32 %v467_v41, 16  ;;  %p1599_p1 = pneg %p1598_p13 }
  0x4b   : > { %v516_v56 = vshrl.u32 %v468_v48, 16  ;;  %v517_v61 = vshrl.u32 %v469_v52, 16  ;;  %v518_v26 = vshrl.u32 %v470_v15, 16  ;;  %v471_v42 = vadd.s32 %v1835_v20, %v420_v33 }
  0x4c   : > { %v608_v53 = vmul.u32 2146121005, %v560_v44  ;;  %v609_v54 = vmul.u32 2146121005, %v561_v45  ;;  %v562_v58 = vxor.u32 %v514_v49, %v466_v40  ;;  %v563_v59 = vxor.u32 %v515_v50, %v467_v41  ;;  %p1604_p5 = pnand %p1603_p4, %p1599_p1 }
  0x4d   : > { %v564_v0 = vxor.u32 %v516_v56, %v468_v48  ;;  %v565_v10 = vxor.u32 %v517_v61, %v469_v52  ;;  %v566_v38 = vxor.u32 %v518_v26, %v470_v15  ;;  %v519_v52 = vshrl.u32 %v471_v42, 16 }
  0x4e   : > { %v656_v62 = vshrl.u32 %v608_v53, 15  ;;  %v657_v63 = vshrl.u32 %v609_v54, 15  ;;  %v610_v7 = vmul.u32 2146121005, %v562_v58  ;;  %v611_v8 = vmul.u32 2146121005, %v563_v59 }
  0x4f   : > { %v612_v13 = vmul.u32 2146121005, %v564_v0  ;;  %v613_v18 = vmul.u32 2146121005, %v565_v10  ;;  %v614_v48 = vmul.u32 2146121005, %v566_v38 }
  0x50   : > { %v704_v11 = vxor.u32 %v656_v62, %v608_v53  ;;  %v705_v12 = vxor.u32 %v657_v63, %v609_v54  ;;  %v658_v16 = vshrl.u32 %v610_v7, 15  ;;  %v659_v17 = vshrl.u32 %v611_v8, 15  ;;  %v292_v10 = vld [vmem:[%s1806_s29 + $0x28] sm:$0xff] }
  0x51   : > { %v660_v25 = vshrl.u32 %v612_v13, 15  ;;  %v661_v32 = vshrl.u32 %v613_v18, 15  ;;  %v662_v57 = vshrl.u32 %v614_v48, 15  ;;  %v567_v62 = vxor.u32 %v519_v52, %v471_v42  ;;  %v294_v42 = vld [vmem:[%s1806_s29 + $0x38] sm:$0xff] }
  0x52   : > { %v752_v22 = vmul.u32 2221713035, %v704_v11  ;;  %v753_v23 = vmul.u32 2221713035, %v705_v12  ;;  %v706_v27 = vxor.u32 %v658_v16, %v610_v7  ;;  %v707_v28 = vxor.u32 %v659_v17, %v611_v8 }
  0x53   : > { %v708_v36 = vxor.u32 %v660_v25, %v612_v13  ;;  %v709_v41 = vxor.u32 %v661_v32, %v613_v18  ;;  %v710_v6 = vxor.u32 %v662_v57, %v614_v48  ;;  %v615_v12 = vmul.u32 2146121005, %v567_v62  ;;  %v1926_v57 = vld [vmem:[%s1806_s29 + $0x40] sm:$0xff] }
  0x54   : > { %v800_v34 = vshrl.u32 %v752_v22, 16  ;;  %v801_v35 = vshrl.u32 %v753_v23, 16  ;;  %v754_v39 = vmul.u32 2221713035, %v706_v27  ;;  %v755_v40 = vmul.u32 2221713035, %v707_v28 }
  0x55   : > { %v756_v45 = vmul.u32 2221713035, %v708_v36  ;;  %v757_v51 = vmul.u32 2221713035, %v709_v41  ;;  %v368_v15 = vmul.u32 256, %v1843_v24  ;;  %v663_v27 = vshrl.u32 %v615_v12, 15 }
  0x56   : > { %v848_v43 = vxor.u32 %v800_v34, %v752_v22  ;;  %v849_v44 = vxor.u32 %v801_v35, %v753_v23  ;;  %v802_v49 = vshrl.u32 %v754_v39, 16  ;;  %v803_v50 = vshrl.u32 %v755_v40, 16  ;;  %v245_v24 = vld [vmem:[%s1798_s13 + $0x30] sm:$0xff] }
  0x57   : > { %v804_v56 = vshrl.u32 %v756_v45, 16  ;;  %v805_v61 = vshrl.u32 %v757_v51, 16  ;;  %v758_v26 = vmul.u32 2221713035, %v710_v6  ;;  %v711_v34 = vxor.u32 %v663_v27, %v615_v12  ;;  %v293_v36 = vld [vmem:[%s1806_s29 + $0x30] sm:$0xff] }
  0x58   : > { %v896_v53 = vshrl.u32 %v848_v43, 8  ;;  %v897_v54 = vshrl.u32 %v849_v44, 8  ;;  %v850_v58 = vxor.u32 %v802_v49, %v754_v39  ;;  %v851_v59 = vxor.u32 %v803_v50, %v755_v40 }
  0x59   : > { %v852_v4 = vxor.u32 %v804_v56, %v756_v45  ;;  %v853_v11 = vxor.u32 %v805_v61, %v757_v51  ;;  %v806_v33 = vshrl.u32 %v758_v26, 16  ;;  %v369_v35 = vmul.u32 256, %v1849_v29 }
  0x5a   : > { %v1401_v63 = vxor.u32 2147483648, %v896_v53  ;;  %v1402_v0 = vxor.u32 2147483648, %v897_v54  ;;  %v898_v7 = vshrl.u32 %v850_v58, 8  ;;  %v899_v8 = vshrl.u32 %v851_v59, 8 }
  0x5b   : > { %v900_v13 = vshrl.u32 %v852_v4, 8  ;;  %v901_v25 = vshrl.u32 %v853_v11, 8  ;;  %v854_v38 = vxor.u32 %v806_v33, %v758_v26  ;;  %v759_v39 = vmul.u32 2221713035, %v711_v34  ;;  %v1940_v26 = vld [vmem:[%s1806_s29 + $0x48] sm:$0xff] }
  0x5c   : > { %vm946_vm0 = vcmp.lt.s32.totalorder %v1401_v63, 2162583142  ;;  %vm949_vm1 = vcmp.lt.s32.totalorder %v1402_v0, 2162583142  ;;  %v1403_v18 = vxor.u32 2147483648, %v898_v7  ;;  %v1404_v22 = vxor.u32 2147483648, %v899_v8 }
  0x5d   : > { %v1184_v16 = vsel %vm946_vm0, %v1852_v30, %v1830_v14  ;;  %v1185_v17 = vsel %vm949_vm1, %v1860_v37, %v1838_v21  ;;  %v1405_v23 = vxor.u32 2147483648, %v900_v13  ;;  %v1141_v14 = vadd.f32 %v1093_v19, %v292_v10  ;;  %v246_v19 = vld [vmem:[%s1798_s13 + $0x38] sm:$0xff]  ;;  %v248_v63 = vld [vmem:[%s1798_s13 + $0x48] sm:$0xff] }
  0x5e   : > { %1232 = vst [vmem:[%s1897_s12] sm:$0xff] %v1184_v16  ;;  %vm952_vm2 = vcmp.lt.s32.totalorder %v1403_v18, 2162583142  ;;  %vm955_vm3 = vcmp.lt.s32.totalorder %v1404_v22, 2162583142  ;;  %v393_v21 = vadd.s32 %v1817_v3, %v368_v15  ;;  %v1406_v28 = vxor.u32 2147483648, %v901_v25 }
  0x5f   : > { %1233 = vst [vmem:[%s1897_s12 + $0x8] sm:$0xff] %v1185_v17  ;;  %v1186_v30 = vsel %vm952_vm2, %v1868_v46, %v1855_v31  ;;  %v1187_v37 = vsel %vm955_vm3, %v1880_v60, %v1871_v47  ;;  %vm958_vm4 = vcmp.lt.s32.totalorder %v1405_v23, 2162583142  ;;  %v1094_v31 = vmul.f32 1.1111112, %v245_v24  ;;  %v250_v23 = vld [vmem:[%s1798_s13 + $0x58] sm:$0xff] }
  0x60   : > { %1234 = vst [vmem:[%s1897_s12 + $0x10] sm:$0xff] %v1186_v30  ;;  %v1188_v32 = vsel %vm958_vm4, %v1885_v9, %v1876_v55  ;;  %vm961_vm5 = vcmp.lt.s32.totalorder %v1406_v28, 2162583142  ;;  %v421_v46 = vadd.s32 %v393_v21, %v1815_v2  ;;  %v422_v47 = vadd.s32 %v393_v21, %v1821_v5  ;;  %v247_v9 = vld [vmem:[%s1798_s13 + $0x40] sm:$0xff] }
  0x61   : > { %1235 = vst [vmem:[%s1897_s12 + $0x18] sm:$0xff] %v1187_v37  ;;  %v1189_v60 = vsel %vm961_vm5, %v1141_v14, %v292_v10  ;;  %v1095_v55 = vmul.f32 1.1111112, %v246_v19  ;;  %v902_v41 = vshrl.u32 %v854_v38, 8  ;;  %v807_v43 = vshrl.u32 %v759_v39, 16  ;;  %v249_v10 = vld [vmem:[%s1798_s13 + $0x50] sm:$0xff] }
  0x62   : > { %1236 = vst [vmem:[%s1897_s12 + $0x20] sm:$0xff] %v1188_v32  ;;  %v472_v40 = vadd.s32 %v1835_v20, %v421_v46  ;;  %v473_v29 = vadd.s32 %v1835_v20, %v422_v47  ;;  %v394_v44 = vadd.s32 %v1817_v3, %v369_v35  ;;  %v342_v45 = vadd.s32 48, %v1813_v1  ;;  %v1945_v32 = vld [vmem:[%s1806_s29 + $0x50] sm:$0xff]  ;;  %v1951_v38 = vld [vmem:[%s1806_s29 + $0x58] sm:$0xff] }
  0x63   : > { %1237 = vst [vmem:[%s1897_s12 + $0x28] sm:$0xff] %v1189_v60  ;;  %v1142_v48 = vadd.f32 %v1094_v31, %v293_v36  ;;  %v1407_v51 = vxor.u32 2147483648, %v902_v41  ;;  %v855_v52 = vxor.u32 %v807_v43, %v759_v39  ;;  %v1096_v53 = vmul.f32 1.1111112, %v247_v9 }
  0x64   : > { %v520_v49 = vshrl.u32 %v472_v40, 16  ;;  %v521_v50 = vshrl.u32 %v473_v29, 16  ;;  %v423_v54 = vadd.s32 %v394_v44, %v1815_v2  ;;  %v1143_v56 = vadd.f32 %v1095_v55, %v294_v42 }
  0x65   : > { %v424_v61 = vadd.s32 %v394_v44, %v1821_v5  ;;  %vm964_vm6 = vcmp.lt.s32.totalorder %v1407_v51, 2162583142  ;;  %v903_v62 = vshrl.u32 %v855_v52, 8  ;;  %v370_v4 = vmul.u32 256, %v342_v45  ;;  %v251_v44 = vld [vmem:[%s1798_s13 + $0x60] sm:$0xff] }
  0x66   : > { %v568_v58 = vxor.u32 %v520_v49, %v472_v40  ;;  %v569_v59 = vxor.u32 %v521_v50, %v473_v29  ;;  %v474_v0 = vadd.s32 %v1835_v20, %v423_v54  ;;  %v1190_v6 = vsel %vm964_vm6, %v1142_v48, %v293_v36 }
  0x67   : > { %v475_v11 = vadd.s32 %v1835_v20, %v424_v61  ;;  %1238 = vst [vmem:[%s1897_s12 + $0x30] sm:$0xff] %v1190_v6  ;;  %v1408_v12 = vxor.u32 2147483648, %v903_v62  ;;  %v1935_v13 = vadd.f32 %v1096_v53, %v1926_v57  ;;  %v395_v16 = vadd.s32 %v1817_v3, %v370_v4 }
  0x68   : > { %v616_v7 = vmul.u32 2146121005, %v568_v58  ;;  %v617_v8 = vmul.u32 2146121005, %v569_v59  ;;  %v522_v15 = vshrl.u32 %v474_v0, 16  ;;  %v343_v9 = vadd.s32 56, %v1813_v1 }
  0x69   : > { %v1097_v22 = vmul.f32 1.1111112, %v248_v63  ;;  %v523_v25 = vshrl.u32 %v475_v11, 16  ;;  %vm967_vm7 = vcmp.lt.s32.totalorder %v1408_v12, 2162583142  ;;  %v425_v24 = vadd.s32 %v395_v16, %v1815_v2 }
  0x6a   : > { %v664_v17 = vshrl.u32 %v616_v7, 15  ;;  %v665_v18 = vshrl.u32 %v617_v8, 15  ;;  %v570_v27 = vxor.u32 %v522_v15, %v474_v0  ;;  %v1098_v14 = vmul.f32 1.1111112, %v249_v10 }
  0x6b   : > { %v1191_v21 = vsel %vm967_vm7, %v1143_v56, %v294_v42  ;;  %v571_v28 = vxor.u32 %v523_v25, %v475_v11  ;;  %v1099_v19 = vmul.f32 1.1111112, %v250_v23  ;;  %v476_v34 = vadd.s32 %v1835_v20, %v425_v24  ;;  %v252_v25 = vld [vmem:[%s1798_s13 + $0x68] sm:$0xff] }
  0x6c   : > { %v712_v30 = vxor.u32 %v664_v17, %v616_v7  ;;  %v713_v37 = vxor.u32 %v665_v18, %v617_v8  ;;  %1239 = vst [vmem:[%s1897_s12 + $0x38] sm:$0xff] %v1191_v21  ;;  %v618_v33 = vmul.u32 2146121005, %v570_v27  ;;  %v426_v35 = vadd.s32 %v395_v16, %v1821_v5 }
  0x6d   : > { %v1145_v47 = vadd.f32 %v1097_v22, %v1940_v26  ;;  %v619_v60 = vmul.u32 2146121005, %v571_v28  ;;  %v524_v39 = vshrl.u32 %v476_v34, 16  ;;  %v1146_v41 = vadd.f32 %v1098_v14, %v1945_v32  ;;  %v299_v28 = vld [vmem:[%s1806_s29 + $0x60] sm:$0xff] }
  0x6e   : > { %v760_v31 = vmul.u32 2221713035, %v712_v30  ;;  %v761_v46 = vmul.u32 2221713035, %v713_v37  ;;  %v666_v36 = vshrl.u32 %v618_v33, 15  ;;  %v477_v55 = vadd.s32 %v1835_v20, %v426_v35 }
  0x6f   : > { %v667_v42 = vshrl.u32 %v619_v60, 15  ;;  %v572_v45 = vxor.u32 %v524_v39, %v476_v34  ;;  %v371_v49 = vmul.u32 256, %v343_v9  ;;  %v1147_v53 = vadd.f32 %v1099_v19, %v1951_v38  ;;  %v253_v9 = vld [vmem:[%s1798_s13 + $0x70] sm:$0xff] }
  0x70   : > { %v808_v40 = vshrl.u32 %v760_v31, 16  ;;  %v809_v29 = vshrl.u32 %v761_v46, 16  ;;  %v714_v43 = vxor.u32 %v666_v36, %v618_v33  ;;  %v525_v48 = vshrl.u32 %v477_v55, 16 }
  0x71   : > { %v715_v52 = vxor.u32 %v667_v42, %v619_v60  ;;  %v620_v56 = vmul.u32 2146121005, %v572_v45  ;;  %v396_v59 = vadd.s32 %v1817_v3, %v371_v49  ;;  %v1100_v0 = vmul.f32 1.1111112, %v251_v44 }
  0x72   : > { %v856_v50 = vxor.u32 %v808_v40, %v760_v31  ;;  %v857_v51 = vxor.u32 %v809_v29, %v761_v46  ;;  %v762_v54 = vmul.u32 2221713035, %v714_v43  ;;  %v573_v58 = vxor.u32 %v525_v48, %v477_v55  ;;  %v300_v55 = vld [vmem:[%s1806_s29 + $0x68] sm:$0xff]  ;;  %v254_v48 = vld [vmem:[%s1798_s13 + $0x78] sm:$0xff] }
  0x73   : > { %v763_v63 = vmul.u32 2221713035, %v715_v52  ;;  %v668_v6 = vshrl.u32 %v620_v56, 15  ;;  %v427_v8 = vadd.s32 %v396_v59, %v1815_v2  ;;  %v428_v15 = vadd.s32 %v396_v59, %v1821_v5 }
  0x74   : > { %v904_v61 = vshrl.u32 %v856_v50, 8  ;;  %v905_v62 = vshrl.u32 %v857_v51, 8  ;;  %v810_v4 = vshrl.u32 %v762_v54, 16  ;;  %v621_v7 = vmul.u32 2146121005, %v573_v58 }
  0x75   : > { %v811_v12 = vshrl.u32 %v763_v63, 16  ;;  %v716_v17 = vxor.u32 %v668_v6, %v620_v56  ;;  %v478_v22 = vadd.s32 %v1835_v20, %v427_v8  ;;  %v479_v27 = vadd.s32 %v1835_v20, %v428_v15 }
  0x76   : > { %v1409_v10 = vxor.u32 2147483648, %v904_v61  ;;  %v1410_v11 = vxor.u32 2147483648, %v905_v62  ;;  %v858_v16 = vxor.u32 %v810_v4, %v762_v54  ;;  %v669_v18 = vshrl.u32 %v621_v7, 15 }
  0x77   : > { %v859_v23 = vxor.u32 %v811_v12, %v763_v63  ;;  %v764_v30 = vmul.u32 2221713035, %v716_v17  ;;  %v526_v19 = vshrl.u32 %v478_v22, 16  ;;  %v527_v34 = vshrl.u32 %v479_v27, 16 }
  0x78   : > { %vm970_vm8 = vcmp.lt.s32.totalorder %v1409_v10, 2162583142  ;;  %vm973_vm9 = vcmp.lt.s32.totalorder %v1410_v11, 2162583142  ;;  %v906_v21 = vshrl.u32 %v858_v16, 8  ;;  %v717_v33 = vxor.u32 %v669_v18, %v621_v7  ;;  %v301_v11 = vld [vmem:[%s1806_s29 + $0x70] sm:$0xff] }
  0x79   : > { %v1192_v14 = vsel %vm970_vm8, %v1935_v13, %v1926_v57  ;;  %v1193_v24 = vsel %vm973_vm9, %v1145_v47, %v1940_v26  ;;  %v907_v37 = vshrl.u32 %v859_v23, 8  ;;  %v812_v31 = vshrl.u32 %v764_v30, 16  ;;  %v255_v18 = vld [vmem:[%s1798_s13 + $0x80] sm:$0xff] }
  0x7a   : > { %1240 = vst [vmem:[%s1897_s12 + $0x40] sm:$0xff] %v1192_v14  ;;  %v1411_v35 = vxor.u32 2147483648, %v906_v21  ;;  %v1101_v46 = vmul.f32 1.1111112, %v252_v25  ;;  %v344_v60 = vadd.s32 64, %v1813_v1  ;;  %v574_v26 = vxor.u32 %v526_v19, %v478_v22 }
  0x7b   : > { %1241 = vst [vmem:[%s1897_s12 + $0x48] sm:$0xff] %v1193_v24  ;;  %v1412_v57 = vxor.u32 2147483648, %v907_v37  ;;  %v765_v13 = vmul.u32 2221713035, %v717_v33  ;;  %v575_v47 = vxor.u32 %v527_v34, %v479_v27  ;;  %v860_v36 = vxor.u32 %v812_v31, %v764_v30  ;;  %v302_v37 = vld [vmem:[%s1806_s29 + $0x78] sm:$0xff] }
  0x7c   : > { %vm976_vm10 = vcmp.lt.s32.totalorder %v1411_v35, 2162583142  ;;  %v1148_v39 = vadd.f32 %v1100_v0, %v299_v28  ;;  %v372_v40 = vmul.u32 256, %v344_v60  ;;  %v622_v43 = vmul.u32 2146121005, %v574_v26  ;;  %v1994_v60 = vld [vmem:[%s1806_s29 + $0x80] sm:$0xff] }
  0x7d   : > { %v1194_v29 = vsel %vm976_vm10, %v1146_v41, %v1945_v32  ;;  %vm979_vm11 = vcmp.lt.s32.totalorder %v1412_v57, 2162583142  ;;  %v813_v42 = vshrl.u32 %v765_v13, 16  ;;  %v908_v45 = vshrl.u32 %v860_v36, 8 }
  0x7e   : > { %1242 = vst [vmem:[%s1897_s12 + $0x50] sm:$0xff] %v1194_v29  ;;  %v1195_v44 = vsel %vm979_vm11, %v1147_v53, %v1951_v38  ;;  %v623_v49 = vmul.u32 2146121005, %v575_v47  ;;  %v397_v50 = vadd.s32 %v1817_v3, %v372_v40  ;;  %v1149_v52 = vadd.f32 %v1101_v46, %v300_v55 }
  0x7f   : > { %1243 = vst [vmem:[%s1897_s12 + $0x58] sm:$0xff] %v1195_v44  ;;  %v861_v51 = vxor.u32 %v813_v42, %v765_v13  ;;  %v670_v54 = vshrl.u32 %v622_v43, 15  ;;  %v1102_v56 = vmul.f32 1.1111112, %v253_v9  ;;  %v1413_v58 = vxor.u32 2147483648, %v908_v45 }
  0x80   : > { %v671_v59 = vshrl.u32 %v623_v49, 15  ;;  %v429_v32 = vadd.s32 %v397_v50, %v1815_v2  ;;  %v430_v41 = vadd.s32 %v397_v50, %v1821_v5  ;;  %v1103_v53 = vmul.f32 1.1111112, %v254_v48  ;;  %v257_v50 = vld [vmem:[%s1798_s13 + $0x90] sm:$0xff] }
  0x81   : > { %v909_v61 = vshrl.u32 %v861_v51, 8  ;;  %v718_v38 = vxor.u32 %v670_v54, %v622_v43  ;;  %v345_v62 = vadd.s32 72, %v1813_v1  ;;  %vm982_vm12 = vcmp.lt.s32.totalorder %v1413_v58, 2162583142 }
  0x82   : > { %v719_v63 = vxor.u32 %v671_v59, %v623_v49  ;;  %v480_v0 = vadd.s32 %v1835_v20, %v429_v32  ;;  %v481_v4 = vadd.s32 %v1835_v20, %v430_v41  ;;  %v1196_v6 = vsel %vm982_vm12, %v1148_v39, %v299_v28  ;;  %v256_v49 = vld [vmem:[%s1798_s13 + $0x88] sm:$0xff] }
  0x83   : > { %v1414_v7 = vxor.u32 2147483648, %v909_v61  ;;  %v766_v8 = vmul.u32 2221713035, %v718_v38  ;;  %v373_v10 = vmul.u32 256, %v345_v62  ;;  %1244 = vst [vmem:[%s1897_s12 + $0x60] sm:$0xff] %v1196_v6  ;;  %v346_v23 = vadd.s32 80, %v1813_v1 }
  0x84   : > { %v767_v12 = vmul.u32 2221713035, %v719_v63  ;;  %v528_v15 = vshrl.u32 %v480_v0, 16  ;;  %v529_v16 = vshrl.u32 %v481_v4, 16  ;;  %v1150_v30 = vadd.f32 %v1102_v56, %v301_v11 }
  0x85   : > { %vm985_vm13 = vcmp.lt.s32.totalorder %v1414_v7, 2162583142  ;;  %v814_v17 = vshrl.u32 %v766_v8, 16  ;;  %v398_v22 = vadd.s32 %v1817_v3, %v373_v10  ;;  %v1104_v35 = vmul.f32 1.1111112, %v255_v18 }
  0x86   : > { %v1197_v25 = vsel %vm985_vm13, %v1149_v52, %v300_v55  ;;  %v815_v27 = vshrl.u32 %v767_v12, 16  ;;  %v576_v14 = vxor.u32 %v528_v15, %v480_v0  ;;  %v577_v24 = vxor.u32 %v529_v16, %v481_v4  ;;  %v258_v0 = vld [vmem:[%s1798_s13 + $0x98] sm:$0xff] }
  0x87   : > { %1245 = vst [vmem:[%s1897_s12 + $0x68] sm:$0xff] %v1197_v25  ;;  %v862_v21 = vxor.u32 %v814_v17, %v766_v8  ;;  %v431_v28 = vadd.s32 %v398_v22, %v1815_v2  ;;  %v432_v33 = vadd.s32 %v398_v22, %v1821_v5  ;;  %v374_v26 = vmul.u32 256, %v346_v23 }
  0x88   : > { %v863_v19 = vxor.u32 %v815_v27, %v767_v12  ;;  %v624_v34 = vmul.u32 2146121005, %v576_v14  ;;  %v625_v31 = vmul.u32 2146121005, %v577_v24  ;;  %v1151_v36 = vadd.f32 %v1103_v53, %v302_v37  ;;  %v304_v12 = vld [vmem:[%s1806_s29 + $0x88] sm:$0xff]  ;;  %v305_v24 = vld [vmem:[%s1806_s29 + $0x90] sm:$0xff] }
  0x89   : > { %v910_v46 = vshrl.u32 %v862_v21, 8  ;;  %v482_v57 = vadd.s32 %v1835_v20, %v431_v28  ;;  %v483_v13 = vadd.s32 %v1835_v20, %v432_v33  ;;  %v399_v42 = vadd.s32 %v1817_v3, %v374_v26  ;;  %v306_v26 = vld [vmem:[%s1806_s29 + $0x98] sm:$0xff] }
  0x8a   : > { %v911_v47 = vshrl.u32 %v863_v19, 8  ;;  %v672_v39 = vshrl.u32 %v624_v34, 15  ;;  %v673_v55 = vshrl.u32 %v625_v31, 15  ;;  %v1152_v45 = vadd.f32 %v1104_v35, %v1994_v60 }
  0x8b   : > { %v1415_v9 = vxor.u32 2147483648, %v910_v46  ;;  %v530_v40 = vshrl.u32 %v482_v57, 16  ;;  %v531_v29 = vshrl.u32 %v483_v13, 16  ;;  %v433_v54 = vadd.s32 %v399_v42, %v1815_v2 }
  0x8c   : > { %v1416_v43 = vxor.u32 2147483648, %v911_v47  ;;  %v720_v44 = vxor.u32 %v672_v39, %v624_v34  ;;  %v721_v48 = vxor.u32 %v673_v55, %v625_v31  ;;  %v1105_v63 = vmul.f32 1.1111112, %v256_v49  ;;  %v260_v49 = vld [vmem:[%s1798_s13 + $0xa8] sm:$0xff] }
  0x8d   : > { %vm988_vm14 = vcmp.lt.s32.totalorder %v1415_v9, 2162583142  ;;  %v578_v51 = vxor.u32 %v530_v40, %v482_v57  ;;  %v579_v52 = vxor.u32 %v531_v29, %v483_v13  ;;  %v484_v38 = vadd.s32 %v1835_v20, %v433_v54 }
  0x8e   : > { %v1198_v56 = vsel %vm988_vm14, %v1150_v30, %v301_v11  ;;  %vm991_vm15 = vcmp.lt.s32.totalorder %v1416_v43, 2162583142  ;;  %v768_v58 = vmul.u32 2221713035, %v720_v44  ;;  %v769_v59 = vmul.u32 2221713035, %v721_v48 }
  0x8f   : > { %1246 = vst [vmem:[%s1897_s12 + $0x70] sm:$0xff] %v1198_v56  ;;  %v1199_v32 = vsel %vm991_vm15, %v1151_v36, %v302_v37  ;;  %v626_v41 = vmul.u32 2146121005, %v578_v51  ;;  %v627_v61 = vmul.u32 2146121005, %v579_v52  ;;  %v434_v4 = vadd.s32 %v399_v42, %v1821_v5  ;;  %v259_v36 = vld [vmem:[%s1798_s13 + $0xa0] sm:$0xff] }
  0x90   : > { %1247 = vst [vmem:[%s1897_s12 + $0x78] sm:$0xff] %v1199_v32  ;;  %v816_v53 = vshrl.u32 %v768_v58, 16  ;;  %v817_v62 = vshrl.u32 %v769_v59, 16  ;;  %v1106_v7 = vmul.f32 1.1111112, %v257_v50  ;;  %v532_v10 = vshrl.u32 %v484_v38, 16 }
  0x91   : > { %v674_v6 = vshrl.u32 %v626_v41, 15  ;;  %v675_v8 = vshrl.u32 %v627_v61, 15  ;;  %v485_v16 = vadd.s32 %v1835_v20, %v434_v4  ;;  %v347_v17 = vadd.s32 88, %v1813_v1  ;;  %v261_v4 = vld [vmem:[%s1798_s13 + $0xb0] sm:$0xff] }
  0x92   : > { %v864_v11 = vxor.u32 %v816_v53, %v768_v58  ;;  %v865_v15 = vxor.u32 %v817_v62, %v769_v59  ;;  %v1107_v23 = vmul.f32 1.1111112, %v258_v0  ;;  %v580_v25 = vxor.u32 %v532_v10, %v484_v38  ;;  %v307_v62 = vld [vmem:[%s1806_s29 + $0xa0] sm:$0xff] }
  0x93   : > { %v722_v18 = vxor.u32 %v674_v6, %v626_v41  ;;  %v723_v22 = vxor.u32 %v675_v8, %v627_v61  ;;  %v533_v21 = vshrl.u32 %v485_v16, 16  ;;  %v375_v30 = vmul.u32 256, %v347_v17 }
  0x94   : > { %v912_v27 = vshrl.u32 %v864_v11, 8  ;;  %v913_v14 = vshrl.u32 %v865_v15, 8  ;;  %v1153_v37 = vadd.f32 %v1105_v63, %v304_v12  ;;  %v628_v19 = vmul.u32 2146121005, %v580_v25 }
  0x95   : > { %v770_v28 = vmul.u32 2221713035, %v722_v18  ;;  %v771_v33 = vmul.u32 2221713035, %v723_v22  ;;  %v581_v31 = vxor.u32 %v533_v21, %v485_v16  ;;  %v400_v46 = vadd.s32 %v1817_v3, %v375_v30  ;;  %v308_v16 = vld [vmem:[%s1806_s29 + $0xa8] sm:$0xff] }
  0x96   : > { %v1417_v34 = vxor.u32 2147483648, %v912_v27  ;;  %v1418_v35 = vxor.u32 2147483648, %v913_v14  ;;  %v1154_v13 = vadd.f32 %v1106_v7, %v305_v24  ;;  %v676_v39 = vshrl.u32 %v628_v19, 15 }
  0x97   : > { %v818_v57 = vshrl.u32 %v770_v28, 16  ;;  %v819_v47 = vshrl.u32 %v771_v33, 16  ;;  %v629_v55 = vmul.u32 2146121005, %v581_v31  ;;  %v435_v9 = vadd.s32 %v400_v46, %v1815_v2 }
  0x98   : > { %vm994_vm0 = vcmp.lt.s32.totalorder %v1417_v34, 2162583142  ;;  %vm997_vm1 = vcmp.lt.s32.totalorder %v1418_v35, 2162583142  ;;  %v1155_v44 = vadd.f32 %v1107_v23, %v306_v26  ;;  %v724_v48 = vxor.u32 %v676_v39, %v628_v19  ;;  %v262_v23 = vld [vmem:[%s1798_s13 + $0xb8] sm:$0xff] }
  0x99   : > { %v1200_v40 = vsel %vm994_vm0, %v1152_v45, %v1994_v60  ;;  %v1201_v29 = vsel %vm997_vm1, %v1153_v37, %v304_v12  ;;  %v866_v42 = vxor.u32 %v818_v57, %v770_v28  ;;  %v867_v43 = vxor.u32 %v819_v47, %v771_v33 }
  0x9a   : > { %1248 = vst [vmem:[%s1897_s12 + $0x80] sm:$0xff] %v1200_v40  ;;  %v677_v50 = vshrl.u32 %v629_v55, 15  ;;  %v486_v51 = vadd.s32 %v1835_v20, %v435_v9  ;;  %v1108_v56 = vmul.f32 1.1111112, %v259_v36  ;;  %v436_v58 = vadd.s32 %v400_v46, %v1821_v5 }
  0x9b   : > { %1249 = vst [vmem:[%s1897_s12 + $0x88] sm:$0xff] %v1201_v29  ;;  %v914_v52 = vshrl.u32 %v866_v42, 8  ;;  %v915_v54 = vshrl.u32 %v867_v43, 8  ;;  %v772_v59 = vmul.u32 2221713035, %v724_v48  ;;  %v348_v32 = vadd.s32 96, %v1813_v1 }
  0x9c   : > { %v725_v60 = vxor.u32 %v677_v50, %v629_v55  ;;  %v534_v45 = vshrl.u32 %v486_v51, 16  ;;  %v1109_v38 = vmul.f32 1.1111112, %v260_v49  ;;  %v487_v53 = vadd.s32 %v1835_v20, %v436_v58 }
  0x9d   : > { %v1419_v41 = vxor.u32 2147483648, %v914_v52  ;;  %v1420_v61 = vxor.u32 2147483648, %v915_v54  ;;  %v820_v63 = vshrl.u32 %v772_v59, 16  ;;  %v376_v7 = vmul.u32 256, %v348_v32 }
  0x9e   : > { %v773_v0 = vmul.u32 2221713035, %v725_v60  ;;  %v582_v6 = vxor.u32 %v534_v45, %v486_v51  ;;  %v535_v8 = vshrl.u32 %v487_v53, 16  ;;  %v349_v10 = vadd.s32 104, %v1813_v1 }
  0x9f   : > { %vm1000_vm2 = vcmp.lt.s32.totalorder %v1419_v41, 2162583142  ;;  %vm1003_vm3 = vcmp.lt.s32.totalorder %v1420_v61, 2162583142  ;;  %v868_v15 = vxor.u32 %v820_v63, %v772_v59  ;;  %v1156_v18 = vadd.f32 %v1108_v56, %v307_v62  ;;  %v264_v59 = vld [vmem:[%s1798_s13 + $0xc8] sm:$0xff] }
  0xa0   : > { %v1202_v11 = vsel %vm1000_vm2, %v1154_v13, %v305_v24  ;;  %v1203_v12 = vsel %vm1003_vm3, %v1155_v44, %v306_v26  ;;  %v821_v17 = vshrl.u32 %v773_v0, 16  ;;  %v630_v22 = vmul.u32 2146121005, %v582_v6  ;;  %v2033_v24 = vld [vmem:[%s1806_s29 + $0xb0] sm:$0xff]  ;;  %v2038_v26 = vld [vmem:[%s1806_s29 + $0xb8] sm:$0xff]  ;;  %v263_v44 = vld [vmem:[%s1798_s13 + $0xc0] sm:$0xff] }
  0xa1   : > { %1250 = vst [vmem:[%s1897_s12 + $0x90] sm:$0xff] %v1202_v11  ;;  %v583_v25 = vxor.u32 %v535_v8, %v487_v53  ;;  %v401_v27 = vadd.s32 %v1817_v3, %v376_v7  ;;  %v916_v14 = vshrl.u32 %v868_v15, 8  ;;  %v1110_v30 = vmul.f32 1.1111112, %v261_v4  ;;  %v2053_v53 = vld [vmem:[%s1806_s29 + $0xc0] sm:$0xff] }
  0xa2   : > { %1251 = vst [vmem:[%s1897_s12 + $0x98] sm:$0xff] %v1203_v12  ;;  %v869_v21 = vxor.u32 %v821_v17, %v773_v0  ;;  %v377_v37 = vmul.u32 256, %v349_v10  ;;  %v1157_v28 = vadd.f32 %v1109_v38, %v308_v16  ;;  %v678_v33 = vshrl.u32 %v630_v22, 15  ;;  %v2058_v12 = vld [vmem:[%s1806_s29 + $0xc8] sm:$0xff] }
  0xa3   : > { %v631_v19 = vmul.u32 2146121005, %v583_v25  ;;  %v437_v34 = vadd.s32 %v401_v27, %v1815_v2  ;;  %v1421_v35 = vxor.u32 2147483648, %v916_v14  ;;  %v1111_v46 = vmul.f32 1.1111112, %v262_v23 }
  0xa4   : > { %v917_v31 = vshrl.u32 %v869_v21, 8  ;;  %v438_v57 = vadd.s32 %v401_v27, %v1821_v5  ;;  %v726_v13 = vxor.u32 %v678_v33, %v630_v22  ;;  %v402_v39 = vadd.s32 %v1817_v3, %v377_v37 }
  0xa5   : > { %v679_v47 = vshrl.u32 %v631_v19, 15  ;;  %v488_v36 = vadd.s32 %v1835_v20, %v437_v34  ;;  %vm1006_vm4 = vcmp.lt.s32.totalorder %v1421_v35, 2162583142  ;;  %v1158_v9 = vadd.f32 %v1110_v30, %v2033_v24 }
  0xa6   : > { %v1422_v55 = vxor.u32 2147483648, %v917_v31  ;;  %v489_v40 = vadd.s32 %v1835_v20, %v438_v57  ;;  %v1204_v29 = vsel %vm1006_vm4, %v1156_v18, %v307_v62  ;;  %v774_v42 = vmul.u32 2221713035, %v726_v13 }
  0xa7   : > { %v727_v43 = vxor.u32 %v679_v47, %v631_v19  ;;  %v536_v48 = vshrl.u32 %v488_v36, 16  ;;  %1252 = vst [vmem:[%s1897_s12 + $0xa0] sm:$0xff] %v1204_v29  ;;  %v1159_v49 = vadd.f32 %v1111_v46, %v2038_v26  ;;  %v439_v51 = vadd.s32 %v402_v39, %v1815_v2  ;;  %v265_v46 = vld [vmem:[%s1798_s13 + $0xd0] sm:$0xff] }
  0xa8   : > { %vm1009_vm5 = vcmp.lt.s32.totalorder %v1422_v55, 2162583142  ;;  %v537_v50 = vshrl.u32 %v489_v40, 16  ;;  %v822_v54 = vshrl.u32 %v774_v42, 16  ;;  %v1112_v60 = vmul.f32 1.1111112, %v263_v44 }
  0xa9   : > { %v1205_v52 = vsel %vm1009_vm5, %v1157_v28, %v308_v16  ;;  %v775_v56 = vmul.u32 2221713035, %v727_v43  ;;  %v584_v58 = vxor.u32 %v536_v48, %v488_v36  ;;  %v490_v32 = vadd.s32 %v1835_v20, %v439_v51  ;;  %v313_v51 = vld [vmem:[%s1806_s29 + $0xd0] sm:$0xff] }
  0xaa   : > { %1253 = vst [vmem:[%s1897_s12 + $0xa8] sm:$0xff] %v1205_v52  ;;  %v585_v45 = vxor.u32 %v537_v50, %v489_v40  ;;  %v440_v41 = vadd.s32 %v402_v39, %v1821_v5  ;;  %v870_v61 = vxor.u32 %v822_v54, %v774_v42  ;;  %v350_v63 = vadd.s32 112, %v1813_v1  ;;  %v266_v42 = vld [vmem:[%s1798_s13 + $0xd8] sm:$0xff] }
  0xab   : > { %v823_v38 = vshrl.u32 %v775_v56, 16  ;;  %v632_v62 = vmul.u32 2146121005, %v584_v58  ;;  %v1113_v4 = vmul.f32 1.1111112, %v264_v59  ;;  %v538_v6 = vshrl.u32 %v490_v32, 16 }
  0xac   : > { %v633_v0 = vmul.u32 2146121005, %v585_v45  ;;  %v491_v7 = vadd.s32 %v1835_v20, %v440_v41  ;;  %v918_v8 = vshrl.u32 %v870_v61, 8  ;;  %v378_v15 = vmul.u32 256, %v350_v63 }
  0xad   : > { %v871_v10 = vxor.u32 %v823_v38, %v775_v56  ;;  %v680_v11 = vshrl.u32 %v632_v62, 15  ;;  %v2061_v16 = vadd.f32 %v1112_v60, %v2053_v53  ;;  %v586_v18 = vxor.u32 %v538_v6, %v490_v32  ;;  %v314_v32 = vld [vmem:[%s1806_s29 + $0xd8] sm:$0xff] }
  0xae   : > { %v681_v17 = vshrl.u32 %v633_v0, 15  ;;  %v539_v22 = vshrl.u32 %v491_v7, 16  ;;  %v1423_v23 = vxor.u32 2147483648, %v918_v8  ;;  %v403_v14 = vadd.s32 %v1817_v3, %v378_v15 }
  0xaf   : > { %v919_v25 = vshrl.u32 %v871_v10, 8  ;;  %v728_v27 = vxor.u32 %v680_v11, %v632_v62  ;;  %v1161_v30 = vadd.f32 %v1113_v4, %v2058_v12  ;;  %v634_v37 = vmul.u32 2146121005, %v586_v18  ;;  %v267_v11 = vld [vmem:[%s1798_s13 + $0xe0] sm:$0xff] }
  0xb0   : > { %v729_v21 = vxor.u32 %v681_v17, %v633_v0  ;;  %v587_v28 = vxor.u32 %v539_v22, %v491_v7  ;;  %vm1012_vm6 = vcmp.lt.s32.totalorder %v1423_v23, 2162583142  ;;  %v441_v34 = vadd.s32 %v403_v14, %v1815_v2 }
  0xb1   : > { %v1424_v33 = vxor.u32 2147483648, %v919_v25  ;;  %v776_v19 = vmul.u32 2221713035, %v728_v27  ;;  %v1206_v35 = vsel %vm1012_vm6, %v1158_v9, %v2033_v24  ;;  %v682_v57 = vshrl.u32 %v634_v37, 15 }
  0xb2   : > { %v777_v31 = vmul.u32 2221713035, %v729_v21  ;;  %v635_v13 = vmul.u32 2146121005, %v587_v28  ;;  %1254 = vst [vmem:[%s1897_s12 + $0xb0] sm:$0xff] %v1206_v35  ;;  %v492_v36 = vadd.s32 %v1835_v20, %v441_v34  ;;  %v442_v39 = vadd.s32 %v403_v14, %v1821_v5  ;;  %v268_v14 = vld [vmem:[%s1798_s13 + $0xe8] sm:$0xff] }
  0xb3   : > { %vm1015_vm7 = vcmp.lt.s32.totalorder %v1424_v33, 2162583142  ;;  %v824_v47 = vshrl.u32 %v776_v19, 16  ;;  %v730_v29 = vxor.u32 %v682_v57, %v634_v37  ;;  %v1114_v9 = vmul.f32 1.1111112, %v265_v46 }
  0xb4   : > { %v1207_v55 = vsel %vm1015_vm7, %v1159_v49, %v2038_v26  ;;  %v825_v40 = vshrl.u32 %v777_v31, 16  ;;  %v683_v43 = vshrl.u32 %v635_v13, 15  ;;  %v540_v44 = vshrl.u32 %v492_v36, 16 }
  0xb5   : > { %1255 = vst [vmem:[%s1897_s12 + $0xb8] sm:$0xff] %v1207_v55  ;;  %v872_v24 = vxor.u32 %v824_v47, %v776_v19  ;;  %v493_v48 = vadd.s32 %v1835_v20, %v442_v39  ;;  %v778_v52 = vmul.u32 2221713035, %v730_v29  ;;  %v351_v56 = vadd.s32 120, %v1813_v1  ;;  %v269_v39 = vld [vmem:[%s1798_s13 + $0xf0] sm:$0xff] }
  0xb6   : > { %v873_v50 = vxor.u32 %v825_v40, %v777_v31  ;;  %v731_v54 = vxor.u32 %v683_v43, %v635_v13  ;;  %v1115_v59 = vmul.f32 1.1111112, %v266_v42  ;;  %v588_v26 = vxor.u32 %v540_v44, %v492_v36  ;;  %v315_v13 = vld [vmem:[%s1806_s29 + $0xe0] sm:$0xff] }
  0xb7   : > { %v920_v58 = vshrl.u32 %v872_v24, 8  ;;  %v541_v49 = vshrl.u32 %v493_v48, 16  ;;  %v826_v45 = vshrl.u32 %v778_v52, 16  ;;  %v379_v61 = vmul.u32 256, %v351_v56 }
  0xb8   : > { %v921_v60 = vshrl.u32 %v873_v50, 8  ;;  %v779_v41 = vmul.u32 2221713035, %v731_v54  ;;  %v1162_v62 = vadd.f32 %v1114_v9, %v313_v51  ;;  %v636_v63 = vmul.u32 2146121005, %v588_v26  ;;  %v316_v9 = vld [vmem:[%s1806_s29 + $0xe8] sm:$0xff] }
  0xb9   : > { %v1425_v38 = vxor.u32 2147483648, %v920_v58  ;;  %v589_v0 = vxor.u32 %v541_v49, %v493_v48  ;;  %v874_v6 = vxor.u32 %v826_v45, %v778_v52  ;;  %v404_v8 = vadd.s32 %v1817_v3, %v379_v61  ;;  %v270_v52 = vld [vmem:[%s1798_s13 + $0xf8] sm:$0xff]  ;;  %v2100_v45 = vld [vmem:[%s1806_s29 + $0xf0] sm:$0xff] }
  0xba   : > { %v1426_v4 = vxor.u32 2147483648, %v921_v60  ;;  %v827_v7 = vshrl.u32 %v779_v41, 16  ;;  %v1163_v10 = vadd.f32 %v1115_v59, %v314_v32  ;;  %v684_v15 = vshrl.u32 %v636_v63, 15 }
  0xbb   : > { %vm1018_vm8 = vcmp.lt.s32.totalorder %v1425_v38, 2162583142  ;;  %v637_v17 = vmul.u32 2146121005, %v589_v0  ;;  %v922_v22 = vshrl.u32 %v874_v6, 8  ;;  %v443_v37 = vadd.s32 %v404_v8, %v1815_v2 }
  0xbc   : > { %v1208_v18 = vsel %vm1018_vm8, %v2061_v16, %v2053_v53  ;;  %vm1021_vm9 = vcmp.lt.s32.totalorder %v1426_v4, 2162583142  ;;  %v875_v23 = vxor.u32 %v827_v7, %v779_v41  ;;  %v732_v27 = vxor.u32 %v684_v15, %v636_v63  ;;  %v2105_v4 = vld [vmem:[%s1806_s29 + $0xf8] sm:$0xff] }
  0xbd   : > { %1256 = vst [vmem:[%s1897_s12 + $0xc0] sm:$0xff] %v1208_v18  ;;  %v1209_v25 = vsel %vm1021_vm9, %v1161_v30, %v2058_v12  ;;  %v685_v21 = vshrl.u32 %v637_v17, 15  ;;  %v1427_v28 = vxor.u32 2147483648, %v922_v22  ;;  %v1116_v19 = vmul.f32 1.1111112, %v267_v11 }
  0xbe   : > { %1257 = vst [vmem:[%s1897_s12 + $0xc8] sm:$0xff] %v1209_v25  ;;  %v923_v33 = vshrl.u32 %v875_v23, 8  ;;  %v444_v53 = vadd.s32 %v404_v8, %v1821_v5  ;;  %v780_v16 = vmul.u32 2221713035, %v732_v27  ;;  %v494_v35 = vadd.s32 %v1835_v20, %v443_v37  ;;  %v271_v23 = vld [vmem:[%s1798_s13 + $0x100] sm:$0xff] }
  0xbf   : > { %v733_v34 = vxor.u32 %v685_v21, %v637_v17  ;;  %v352_v12 = vadd.s32 128, %v1813_v1  ;;  %vm1024_vm10 = vcmp.lt.s32.totalorder %v1427_v28, 2162583142  ;;  %v1117_v31 = vmul.f32 1.1111112, %v268_v14 }
  0xc0   : > { %v1428_v30 = vxor.u32 2147483648, %v923_v33  ;;  %v495_v46 = vadd.s32 %v1835_v20, %v444_v53  ;;  %v1210_v57 = vsel %vm1024_vm10, %v1162_v62, %v313_v51  ;;  %v828_v47 = vshrl.u32 %v780_v16, 16  ;;  %v272_v53 = vld [vmem:[%s1798_s13 + $0x108] sm:$0xff] }
  0xc1   : > { %v781_v36 = vmul.u32 2221713035, %v733_v34  ;;  %v542_v55 = vshrl.u32 %v494_v35, 16  ;;  %1258 = vst [vmem:[%s1897_s12 + $0xd0] sm:$0xff] %v1210_v57  ;;  %v380_v29 = vmul.u32 256, %v352_v12  ;;  %v353_v42 = vadd.s32 136, %v1813_v1 }
  0xc2   : > { %vm1027_vm11 = vcmp.lt.s32.totalorder %v1428_v30, 2162583142  ;;  %v543_v40 = vshrl.u32 %v495_v46, 16  ;;  %v876_v24 = vxor.u32 %v828_v47, %v780_v16  ;;  %v1164_v50 = vadd.f32 %v1116_v19, %v315_v13 }
  0xc3   : > { %v1211_v43 = vsel %vm1027_vm11, %v1163_v10, %v314_v32  ;;  %v829_v44 = vshrl.u32 %v781_v36, 16  ;;  %v590_v48 = vxor.u32 %v542_v55, %v494_v35  ;;  %v1118_v51 = vmul.f32 1.1111112, %v269_v39  ;;  %v2118_v35 = vld [vmem:[%s1806_s29 + $0x100] sm:$0xff] }
  0xc4   : > { %1259 = vst [vmem:[%s1897_s12 + $0xd8] sm:$0xff] %v1211_v43  ;;  %v591_v54 = vxor.u32 %v543_v40, %v495_v46  ;;  %v405_v56 = vadd.s32 %v1817_v3, %v380_v29  ;;  %v924_v58 = vshrl.u32 %v876_v24, 8  ;;  %v381_v49 = vmul.u32 256, %v353_v42  ;;  %v2125_v43 = vld [vmem:[%s1806_s29 + $0x108] sm:$0xff] }
  0xc5   : > { %v877_v59 = vxor.u32 %v829_v44, %v781_v36  ;;  %v638_v26 = vmul.u32 2146121005, %v590_v48  ;;  %v1165_v60 = vadd.f32 %v1117_v31, %v316_v9  ;;  %v1119_v0 = vmul.f32 1.1111112, %v270_v52 }
  0xc6   : > { %v639_v32 = vmul.u32 2146121005, %v591_v54  ;;  %v445_v41 = vadd.s32 %v405_v56, %v1815_v2  ;;  %v446_v61 = vadd.s32 %v405_v56, %v1821_v5  ;;  %v1429_v38 = vxor.u32 2147483648, %v924_v58 }
  0xc7   : > { %v925_v62 = vshrl.u32 %v877_v59, 8  ;;  %v686_v63 = vshrl.u32 %v638_v26, 15  ;;  %v406_v10 = vadd.s32 %v1817_v3, %v381_v49  ;;  %v1166_v17 = vadd.f32 %v1118_v51, %v2100_v45 }
  0xc8   : > { %v687_v6 = vshrl.u32 %v639_v32, 15  ;;  %v496_v7 = vadd.s32 %v1835_v20, %v445_v41  ;;  %v497_v8 = vadd.s32 %v1835_v20, %v446_v61  ;;  %vm1030_vm12 = vcmp.lt.s32.totalorder %v1429_v38, 2162583142 }
  0xc9   : > { %v1430_v11 = vxor.u32 2147483648, %v925_v62  ;;  %v734_v15 = vxor.u32 %v686_v63, %v638_v26  ;;  %v1212_v18 = vsel %vm1030_vm12, %v1164_v50, %v315_v13  ;;  %v1167_v21 = vadd.f32 %v1119_v0, %v2105_v4  ;;  %v273_v62 = vld [vmem:[%s1798_s13 + $0x110] sm:$0xff] }
  0xca   : > { %v735_v22 = vxor.u32 %v687_v6, %v639_v32  ;;  %v544_v25 = vshrl.u32 %v496_v7, 16  ;;  %v545_v27 = vshrl.u32 %v497_v8, 16  ;;  %1260 = vst [vmem:[%s1897_s12 + $0xe0] sm:$0xff] %v1212_v18  ;;  %v447_v37 = vadd.s32 %v406_v10, %v1815_v2  ;;  %v274_v18 = vld [vmem:[%s1798_s13 + $0x118] sm:$0xff] }
  0xcb   : > { %vm1033_vm13 = vcmp.lt.s32.totalorder %v1430_v11, 2162583142  ;;  %v782_v14 = vmul.u32 2221713035, %v734_v15  ;;  %v1120_v12 = vmul.f32 1.1111112, %v271_v23  ;;  %v448_v31 = vadd.s32 %v406_v10, %v1821_v5 }
  0xcc   : > { %v1213_v28 = vsel %vm1033_vm13, %v1165_v60, %v316_v9  ;;  %v783_v33 = vmul.u32 2221713035, %v735_v22  ;;  %v592_v19 = vxor.u32 %v544_v25, %v496_v7  ;;  %v593_v16 = vxor.u32 %v545_v27, %v497_v8 }
  0xcd   : > { %1261 = vst [vmem:[%s1897_s12 + $0xe8] sm:$0xff] %v1213_v28  ;;  %v830_v34 = vshrl.u32 %v782_v14, 16  ;;  %v498_v30 = vadd.s32 %v1835_v20, %v447_v37  ;;  %v354_v47 = vadd.s32 144, %v1813_v1  ;;  %v1121_v39 = vmul.f32 1.1111112, %v272_v53  ;;  %v321_v28 = vld [vmem:[%s1806_s29 + $0x110] sm:$0xff] }
  0xce   : > { %v831_v46 = vshrl.u32 %v783_v33, 16  ;;  %v640_v57 = vmul.u32 2146121005, %v592_v19  ;;  %v641_v13 = vmul.u32 2146121005, %v593_v16  ;;  %v499_v40 = vadd.s32 %v1835_v20, %v448_v31 }
  0xcf   : > { %v878_v36 = vxor.u32 %v830_v34, %v782_v14  ;;  %v546_v55 = vshrl.u32 %v498_v30, 16  ;;  %v382_v9 = vmul.u32 256, %v354_v47  ;;  %v2128_v48 = vadd.f32 %v1120_v12, %v2118_v35  ;;  %v322_v12 = vld [vmem:[%s1806_s29 + $0x118] sm:$0xff] }
  0xd0   : > { %v879_v29 = vxor.u32 %v831_v46, %v783_v33  ;;  %v688_v42 = vshrl.u32 %v640_v57, 15  ;;  %v689_v24 = vshrl.u32 %v641_v13, 15  ;;  %v547_v51 = vshrl.u32 %v499_v40, 16 }
  0xd1   : > { %v926_v44 = vshrl.u32 %v878_v36, 8  ;;  %v594_v50 = vxor.u32 %v546_v55, %v498_v30  ;;  %v407_v58 = vadd.s32 %v1817_v3, %v382_v9  ;;  %v1169_v26 = vadd.f32 %v1121_v39, %v2125_v43 }
  0xd2   : > { %v927_v52 = vshrl.u32 %v879_v29, 8  ;;  %v736_v54 = vxor.u32 %v688_v42, %v640_v57  ;;  %v737_v56 = vxor.u32 %v689_v24, %v641_v13  ;;  %v595_v60 = vxor.u32 %v547_v51, %v499_v40  ;;  %v275_v40 = vld [vmem:[%s1798_s13 + $0x120] sm:$0xff] }
  0xd3   : > { %v1431_v59 = vxor.u32 2147483648, %v926_v44  ;;  %v642_v49 = vmul.u32 2146121005, %v594_v50  ;;  %v449_v38 = vadd.s32 %v407_v58, %v1815_v2  ;;  %v450_v6 = vadd.s32 %v407_v58, %v1821_v5 }
  0xd4   : > { %v1432_v32 = vxor.u32 2147483648, %v927_v52  ;;  %v784_v41 = vmul.u32 2221713035, %v736_v54  ;;  %v785_v61 = vmul.u32 2221713035, %v737_v56  ;;  %v355_v19 = vadd.s32 152, %v1813_v1 }
  0xd5   : > { %vm1036_vm14 = vcmp.lt.s32.totalorder %v1431_v59, 2162583142  ;;  %v690_v63 = vshrl.u32 %v642_v49, 15  ;;  %v643_v0 = vmul.u32 2146121005, %v595_v60  ;;  %v500_v23 = vadd.s32 %v1835_v20, %v449_v38  ;;  %v276_v56 = vld [vmem:[%s1798_s13 + $0x128] sm:$0xff] }
  0xd6   : > { %v1214_v7 = vsel %vm1036_vm14, %v1166_v17, %v2100_v45  ;;  %vm1039_vm15 = vcmp.lt.s32.totalorder %v1432_v32, 2162583142  ;;  %v832_v8 = vshrl.u32 %v784_v41, 16  ;;  %v833_v10 = vshrl.u32 %v785_v61, 16 }
  0xd7   : > { %1262 = vst [vmem:[%s1897_s12 + $0xf0] sm:$0xff] %v1214_v7  ;;  %v1215_v11 = vsel %vm1039_vm15, %v1167_v21, %v2105_v4  ;;  %v738_v15 = vxor.u32 %v690_v63, %v642_v49  ;;  %v691_v22 = vshrl.u32 %v643_v0, 15  ;;  %v1122_v14 = vmul.f32 1.1111112, %v273_v62 }
  0xd8   : > { %1263 = vst [vmem:[%s1897_s12 + $0xf8] sm:$0xff] %v1215_v11  ;;  %v880_v25 = vxor.u32 %v832_v8, %v784_v41  ;;  %v881_v27 = vxor.u32 %v833_v10, %v785_v61  ;;  %v501_v37 = vadd.s32 %v1835_v20, %v450_v6  ;;  %v548_v33 = vshrl.u32 %v500_v23, 16  ;;  %v323_v6 = vld [vmem:[%s1806_s29 + $0x120] sm:$0xff]  ;;  %v324_v11 = vld [vmem:[%s1806_s29 + $0x128] sm:$0xff] }
  0xd9   : > { %v786_v45 = vmul.u32 2221713035, %v738_v15  ;;  %v739_v17 = vxor.u32 %v691_v22, %v643_v0  ;;  %v1123_v53 = vmul.f32 1.1111112, %v274_v18  ;;  %v383_v46 = vmul.u32 256, %v355_v19 }
  0xda   : > { %v928_v4 = vshrl.u32 %v880_v25, 8  ;;  %v929_v21 = vshrl.u32 %v881_v27, 8  ;;  %v549_v16 = vshrl.u32 %v501_v37, 16  ;;  %v596_v31 = vxor.u32 %v548_v33, %v500_v23 }
  0xdb   : > { %v834_v34 = vshrl.u32 %v786_v45, 16  ;;  %v787_v30 = vmul.u32 2221713035, %v739_v17  ;;  %v1170_v47 = vadd.f32 %v1122_v14, %v321_v28  ;;  %v408_v42 = vadd.s32 %v1817_v3, %v383_v46 }
  0xdc   : > { %v1433_v57 = vxor.u32 2147483648, %v928_v4  ;;  %v1434_v13 = vxor.u32 2147483648, %v929_v21  ;;  %v597_v36 = vxor.u32 %v549_v16, %v501_v37  ;;  %v644_v29 = vmul.u32 2146121005, %v596_v31  ;;  %v277_v37 = vld [vmem:[%s1798_s13 + $0x130] sm:$0xff] }
  0xdd   : > { %v882_v39 = vxor.u32 %v834_v34, %v786_v45  ;;  %v835_v55 = vshrl.u32 %v787_v30, 16  ;;  %v1171_v24 = vadd.f32 %v1123_v53, %v322_v12  ;;  %v451_v59 = vadd.s32 %v408_v42, %v1815_v2  ;;  %v278_v53 = vld [vmem:[%s1798_s13 + $0x138] sm:$0xff] }
  0xde   : > { %vm1042_vm0 = vcmp.lt.s32.totalorder %v1433_v57, 2162583142  ;;  %vm1045_vm1 = vcmp.lt.s32.totalorder %v1434_v13, 2162583142  ;;  %v645_v9 = vmul.u32 2146121005, %v597_v36  ;;  %v452_v49 = vadd.s32 %v408_v42, %v1821_v5 }
  0xdf   : > { %v1216_v44 = vsel %vm1042_vm0, %v2128_v48, %v2118_v35  ;;  %v1217_v50 = vsel %vm1045_vm1, %v1169_v26, %v2125_v43  ;;  %v930_v51 = vshrl.u32 %v882_v39, 8  ;;  %v883_v52 = vxor.u32 %v835_v55, %v787_v30 }
  0xe0   : > { %1264 = vst [vmem:[%s1897_s12 + $0x100] sm:$0xff] %v1216_v44  ;;  %v692_v54 = vshrl.u32 %v644_v29, 15  ;;  %v693_v58 = vshrl.u32 %v645_v9, 15  ;;  %v1124_v41 = vmul.f32 1.1111112, %v275_v40  ;;  %v356_v35 = vadd.s32 160, %v1813_v1 }
  0xe1   : > { %1265 = vst [vmem:[%s1897_s12 + $0x108] sm:$0xff] %v1217_v50  ;;  %v1435_v60 = vxor.u32 2147483648, %v930_v51  ;;  %v931_v32 = vshrl.u32 %v883_v52, 8  ;;  %v502_v26 = vadd.s32 %v1835_v20, %v451_v59  ;;  %v503_v61 = vadd.s32 %v1835_v20, %v452_v49 }
  0xe2   : > { %v740_v43 = vxor.u32 %v692_v54, %v644_v29  ;;  %v741_v48 = vxor.u32 %v693_v58, %v645_v9  ;;  %v1125_v62 = vmul.f32 1.1111112, %v276_v56  ;;  %v384_v63 = vmul.u32 256, %v356_v35  ;;  %v325_v9 = vld [vmem:[%s1806_s29 + $0x130] sm:$0xff] }
  0xe3   : > { %vm1048_vm2 = vcmp.lt.s32.totalorder %v1435_v60, 2162583142  ;;  %v1436_v38 = vxor.u32 2147483648, %v931_v32  ;;  %v550_v10 = vshrl.u32 %v502_v26, 16  ;;  %v551_v15 = vshrl.u32 %v503_v61, 16  ;;  %v326_v32 = vld [vmem:[%s1806_s29 + $0x138] sm:$0xff] }
  0xe4   : > { %v1218_v0 = vsel %vm1048_vm2, %v1170_v47, %v321_v28  ;;  %v788_v7 = vmul.u32 2221713035, %v740_v43  ;;  %v789_v8 = vmul.u32 2221713035, %v741_v48  ;;  %v409_v18 = vadd.s32 %v1817_v3, %v384_v63  ;;  %v279_v63 = vld [vmem:[%s1798_s13 + $0x140] sm:$0xff] }
  0xe5   : > { %1266 = vst [vmem:[%s1897_s12 + $0x110] sm:$0xff] %v1218_v0  ;;  %vm1051_vm3 = vcmp.lt.s32.totalorder %v1436_v38, 2162583142  ;;  %v598_v27 = vxor.u32 %v550_v10, %v502_v26  ;;  %v1172_v14 = vadd.f32 %v1124_v41, %v323_v6  ;;  %v599_v28 = vxor.u32 %v551_v15, %v503_v61 }
  0xe6   : > { %v1219_v22 = vsel %vm1051_vm3, %v1171_v24, %v322_v12  ;;  %v836_v23 = vshrl.u32 %v788_v7, 16  ;;  %v837_v25 = vshrl.u32 %v789_v8, 16  ;;  %v453_v45 = vadd.s32 %v409_v18, %v1815_v2 }
  0xe7   : > { %1267 = vst [vmem:[%s1897_s12 + $0x118] sm:$0xff] %v1219_v22  ;;  %v454_v17 = vadd.s32 %v409_v18, %v1821_v5  ;;  %v1173_v4 = vadd.f32 %v1125_v62, %v324_v11  ;;  %v646_v21 = vmul.u32 2146121005, %v598_v27  ;;  %v647_v16 = vmul.u32 2146121005, %v599_v28  ;;  %v280_v22 = vld [vmem:[%s1798_s13 + $0x148] sm:$0xff] }
  0xe8   : > { %v884_v33 = vxor.u32 %v836_v23, %v788_v7  ;;  %v885_v19 = vxor.u32 %v837_v25, %v789_v8  ;;  %v504_v34 = vadd.s32 %v1835_v20, %v453_v45  ;;  %v357_v30 = vadd.s32 168, %v1813_v1 }
  0xe9   : > { %v505_v12 = vadd.s32 %v1835_v20, %v454_v17  ;;  %v694_v57 = vshrl.u32 %v646_v21, 15  ;;  %v1126_v13 = vmul.f32 1.1111112, %v277_v37  ;;  %v695_v47 = vshrl.u32 %v647_v16, 15 }
  0xea   : > { %v932_v31 = vshrl.u32 %v884_v33, 8  ;;  %v933_v46 = vshrl.u32 %v885_v19, 8  ;;  %v552_v36 = vshrl.u32 %v504_v34, 16  ;;  %v385_v55 = vmul.u32 256, %v357_v30 }
  0xeb   : > { %v553_v39 = vshrl.u32 %v505_v12, 16  ;;  %v742_v42 = vxor.u32 %v694_v57, %v646_v21  ;;  %v1127_v24 = vmul.f32 1.1111112, %v278_v53  ;;  %v743_v44 = vxor.u32 %v695_v47, %v647_v16 }
  0xec   : > { %v1437_v40 = vxor.u32 2147483648, %v932_v31  ;;  %v1438_v29 = vxor.u32 2147483648, %v933_v46  ;;  %v600_v50 = vxor.u32 %v552_v36, %v504_v34  ;;  %v410_v52 = vadd.s32 %v1817_v3, %v385_v55 }
  0xed   : > { %v601_v51 = vxor.u32 %v553_v39, %v505_v12  ;;  %v790_v54 = vmul.u32 2221713035, %v742_v42  ;;  %v791_v59 = vmul.u32 2221713035, %v743_v44  ;;  %v1174_v48 = vadd.f32 %v1126_v13, %v325_v9  ;;  %v327_v12 = vld [vmem:[%s1806_s29 + $0x140] sm:$0xff]  ;;  %v328_v39 = vld [vmem:[%s1806_s29 + $0x148] sm:$0xff] }
  0xee   : > { %vm1054_vm4 = vcmp.lt.s32.totalorder %v1437_v40, 2162583142  ;;  %vm1057_vm5 = vcmp.lt.s32.totalorder %v1438_v29, 2162583142  ;;  %v648_v49 = vmul.u32 2146121005, %v600_v50  ;;  %v455_v35 = vadd.s32 %v410_v52, %v1815_v2 }
  0xef   : > { %v1220_v56 = vsel %vm1054_vm4, %v1172_v14, %v323_v6  ;;  %v1221_v58 = vsel %vm1057_vm5, %v1173_v4, %v324_v11  ;;  %v838_v60 = vshrl.u32 %v790_v54, 16  ;;  %v649_v41 = vmul.u32 2146121005, %v601_v51 }
  0xf0   : > { %1268 = vst [vmem:[%s1897_s12 + $0x120] sm:$0xff] %v1220_v56  ;;  %v456_v43 = vadd.s32 %v410_v52, %v1821_v5  ;;  %v839_v26 = vshrl.u32 %v791_v59, 16  ;;  %v696_v61 = vshrl.u32 %v648_v49, 15  ;;  %v358_v38 = vadd.s32 176, %v1813_v1 }
  0xf1   : > { %1269 = vst [vmem:[%s1897_s12 + $0x128] sm:$0xff] %v1221_v58  ;;  %v886_v62 = vxor.u32 %v838_v60, %v790_v54  ;;  %v697_v0 = vshrl.u32 %v649_v41, 15  ;;  %v506_v6 = vadd.s32 %v1835_v20, %v455_v35  ;;  %v1175_v10 = vadd.f32 %v1127_v24, %v326_v32  ;;  %v282_v35 = vld [vmem:[%s1798_s13 + $0x158] sm:$0xff] }
  0xf2   : > { %v507_v7 = vadd.s32 %v1835_v20, %v456_v43  ;;  %v887_v8 = vxor.u32 %v839_v26, %v791_v59  ;;  %v744_v11 = vxor.u32 %v696_v61, %v648_v49  ;;  %v386_v15 = vmul.u32 256, %v358_v38 }
  0xf3   : > { %v934_v18 = vshrl.u32 %v886_v62, 8  ;;  %v745_v23 = vxor.u32 %v697_v0, %v649_v41  ;;  %v554_v25 = vshrl.u32 %v506_v6, 16  ;;  %v1128_v28 = vmul.f32 1.1111112, %v279_v63 }
  0xf4   : > { %v555_v27 = vshrl.u32 %v507_v7, 16  ;;  %v935_v14 = vshrl.u32 %v887_v8, 8  ;;  %v792_v37 = vmul.u32 2221713035, %v744_v11  ;;  %v411_v45 = vadd.s32 %v1817_v3, %v386_v15 }
  0xf5   : > { %v1439_v17 = vxor.u32 2147483648, %v934_v18  ;;  %v793_v33 = vmul.u32 2221713035, %v745_v23  ;;  %v602_v19 = vxor.u32 %v554_v25, %v506_v6  ;;  %v1129_v16 = vmul.f32 1.1111112, %v280_v22  ;;  %v329_v6 = vld [vmem:[%s1806_s29 + $0x150] sm:$0xff] }
  0xf6   : > { %v603_v4 = vxor.u32 %v555_v27, %v507_v7  ;;  %v1440_v21 = vxor.u32 2147483648, %v935_v14  ;;  %v840_v53 = vshrl.u32 %v792_v37, 16  ;;  %v457_v34 = vadd.s32 %v411_v45, %v1815_v2  ;;  %v330_v22 = vld [vmem:[%s1806_s29 + $0x158] sm:$0xff] }
  0xf7   : > { %vm1060_vm6 = vcmp.lt.s32.totalorder %v1439_v17, 2162583142  ;;  %v841_v30 = vshrl.u32 %v793_v33, 16  ;;  %v650_v31 = vmul.u32 2146121005, %v602_v19  ;;  %v458_v46 = vadd.s32 %v411_v45, %v1821_v5 }
  0xf8   : > { %v1222_v57 = vsel %vm1060_vm6, %v1174_v48, %v325_v9  ;;  %vm1063_vm7 = vcmp.lt.s32.totalorder %v1440_v21, 2162583142  ;;  %v888_v13 = vxor.u32 %v840_v53, %v792_v37  ;;  %v651_v47 = vmul.u32 2146121005, %v603_v4  ;;  %v281_v9 = vld [vmem:[%s1798_s13 + $0x150] sm:$0xff] }
  0xf9   : > { %1270 = vst [vmem:[%s1897_s12 + $0x130] sm:$0xff] %v1222_v57  ;;  %v1223_v36 = vsel %vm1063_vm7, %v1175_v10, %v326_v32  ;;  %v889_v55 = vxor.u32 %v841_v30, %v793_v33  ;;  %v698_v40 = vshrl.u32 %v650_v31, 15  ;;  %v508_v29 = vadd.s32 %v1835_v20, %v457_v34  ;;  %v283_v33 = vld [vmem:[%s1798_s13 + $0x160] sm:$0xff] }
  0xfa   : > { %1271 = vst [vmem:[%s1897_s12 + $0x138] sm:$0xff] %v1223_v36  ;;  %v936_v42 = vshrl.u32 %v888_v13, 8  ;;  %v1176_v24 = vadd.f32 %v1128_v28, %v327_v12  ;;  %v699_v44 = vshrl.u32 %v651_v47, 15  ;;  %v509_v50 = vadd.s32 %v1835_v20, %v458_v46  ;;  %v331_v36 = vld [vmem:[%s1806_s29 + $0x160] sm:$0xff] }
  0xfb   : > { %v937_v51 = vshrl.u32 %v889_v55, 8  ;;  %v746_v52 = vxor.u32 %v698_v40, %v650_v31  ;;  %v556_v54 = vshrl.u32 %v508_v29, 16  ;;  %v359_v56 = vadd.s32 184, %v1813_v1 }
  0xfc   : > { %v1441_v58 = vxor.u32 2147483648, %v936_v42  ;;  %v1177_v59 = vadd.f32 %v1129_v16, %v328_v39  ;;  %v747_v49 = vxor.u32 %v699_v44, %v651_v47  ;;  %v557_v60 = vshrl.u32 %v509_v50, 16 }
  0xfd   : > { %v1442_v32 = vxor.u32 2147483648, %v937_v51  ;;  %v794_v41 = vmul.u32 2221713035, %v746_v52  ;;  %v604_v43 = vxor.u32 %v556_v54, %v508_v29  ;;  %v387_v48 = vmul.u32 256, %v359_v56  ;;  %v332_v29 = vld [vmem:[%s1806_s29 + $0x168] sm:$0xff] }
  0xfe   : > { %vm1066_vm8 = vcmp.lt.s32.totalorder %v1441_v58, 2162583142  ;;  %v1130_v26 = vmul.f32 1.1111112, %v281_v9  ;;  %v795_v61 = vmul.u32 2221713035, %v747_v49  ;;  %v605_v38 = vxor.u32 %v557_v60, %v509_v50 }
  0xff   : > { %v1224_v62 = vsel %vm1066_vm8, %v1176_v24, %v327_v12  ;;  %vm1069_vm9 = vcmp.lt.s32.totalorder %v1442_v32, 2162583142  ;;  %v842_v1 = vshrl.u32 %v794_v41, 16  ;;  %v652_v63 = vmul.u32 2146121005, %v604_v43  ;;  %v284_v12 = vld [vmem:[%s1798_s13 + $0x168] sm:$0xff] }
 0x100   : > { %1272 = vst [vmem:[%s1897_s12 + $0x140] sm:$0xff] %v1224_v62  ;;  %v1225_v0 = vsel %vm1069_vm9, %v1177_v59, %v328_v39  ;;  %v843_v7 = vshrl.u32 %v795_v61, 16  ;;  %v653_v8 = vmul.u32 2146121005, %v605_v38  ;;  %v412_v10 = vadd.s32 %v1817_v3, %v387_v48  ;;  %v286_v48 = vld [vmem:[%s1798_s13 + $0x178] sm:$0xff] }
 0x101   : > { %1273 = vst [vmem:[%s1897_s12 + $0x148] sm:$0xff] %v1225_v0  ;;  %v890_v11 = vxor.u32 %v842_v1, %v794_v41  ;;  %v1131_v15 = vmul.f32 1.1111112, %v282_v35  ;;  %v700_v18 = vshrl.u32 %v652_v63, 15  ;;  %v1178_v28 = vadd.f32 %v1130_v26, %v329_v6  ;;  %v285_v41 = vld [vmem:[%s1798_s13 + $0x170] sm:$0xff] }
 0x102   : > { %v891_v23 = vxor.u32 %v843_v7, %v795_v61  ;;  %v701_v25 = vshrl.u32 %v653_v8, 15  ;;  %v459_v27 = vadd.s32 %v412_v10, %v1815_v2  ;;  %v460_v14 = vadd.s32 %v412_v10, %v1821_v5  ;;  %v333_v1 = vld [vmem:[%s1806_s29 + $0x170] sm:$0xff] }
 0x103   : > { %v938_v37 = vshrl.u32 %v890_v11, 8  ;;  %v748_v45 = vxor.u32 %v700_v18, %v652_v63  ;;  %v1179_v53 = vadd.f32 %v1131_v15, %v330_v22  ;;  %v1132_v46 = vmul.f32 1.1111112, %v283_v33 }
 0x104   : > { %v939_v17 = vshrl.u32 %v891_v23, 8  ;;  %v749_v19 = vxor.u32 %v701_v25, %v653_v8  ;;  %v510_v3 = vadd.s32 %v1835_v20, %v459_v27  ;;  %v511_v4 = vadd.s32 %v1835_v20, %v460_v14 }
 0x105   : > { %v1443_v21 = vxor.u32 2147483648, %v938_v37  ;;  %v796_v16 = vmul.u32 2221713035, %v748_v45  ;;  %v1133_v55 = vmul.f32 1.1111112, %v284_v12  ;;  %v1180_v51 = vadd.f32 %v1132_v46, %v331_v36 }
 0x106   : > { %v1444_v34 = vxor.u32 2147483648, %v939_v17  ;;  %v797_v2 = vmul.u32 2221713035, %v749_v19  ;;  %v558_v5 = vshrl.u32 %v510_v3, 16  ;;  %v559_v30 = vshrl.u32 %v511_v4, 16 }
 0x107   : > { %vm1072_vm10 = vcmp.lt.s32.totalorder %v1443_v21, 2162583142  ;;  %v844_v31 = vshrl.u32 %v796_v16, 16  ;;  %v1181_v56 = vadd.f32 %v1133_v55, %v332_v29  ;;  %v1134_v38 = vmul.f32 1.1111112, %v285_v41 }
 0x108   : > { %v1226_v57 = vsel %vm1072_vm10, %v1178_v28, %v329_v6  ;;  %vm1075_vm11 = vcmp.lt.s32.totalorder %v1444_v34, 2162583142  ;;  %v845_v13 = vshrl.u32 %v797_v2, 16  ;;  %v606_v47 = vxor.u32 %v558_v5, %v510_v3  ;;  %v334_v6 = vld [vmem:[%s1806_s29 + $0x178] sm:$0xff] }
 0x109   : > { %1274 = vst [vmem:[%s1897_s12 + $0x150] sm:$0xff] %v1226_v57  ;;  %v1227_v20 = vsel %vm1075_vm11, %v1179_v53, %v330_v22  ;;  %v892_v39 = vxor.u32 %v844_v31, %v796_v16  ;;  %v607_v40 = vxor.u32 %v559_v30, %v511_v4  ;;  %v1135_v0 = vmul.f32 1.1111112, %v286_v48 }
 0x10a   : > { %1275 = vst [vmem:[%s1897_s12 + $0x158] sm:$0xff] %v1227_v20  ;;  %v893_v42 = vxor.u32 %v845_v13, %v797_v2  ;;  %v654_v24 = vmul.u32 2146121005, %v606_v47  ;;  %v1182_v10 = vadd.f32 %v1134_v38, %v333_v1 }
 0x10b   : > { %v940_v44 = vshrl.u32 %v892_v39, 8  ;;  %v655_v50 = vmul.u32 2146121005, %v607_v40  ;;  %v1183_v18 = vadd.f32 %v1135_v0, %v334_v6 }
 0x10c   : > { %v941_v9 = vshrl.u32 %v893_v42, 8  ;;  %v702_v52 = vshrl.u32 %v654_v24, 15 }
 0x10d   : > { %v1445_v54 = vxor.u32 2147483648, %v940_v44  ;;  %v703_v58 = vshrl.u32 %v655_v50, 15 }
 0x10e   : > { %v1446_v59 = vxor.u32 2147483648, %v941_v9  ;;  %v750_v49 = vxor.u32 %v702_v52, %v654_v24 }
 0x10f   : > { %vm1078_vm12 = vcmp.lt.s32.totalorder %v1445_v54, 2162583142  ;;  %v751_v60 = vxor.u32 %v703_v58, %v655_v50 }
 0x110   : > { %v1228_v32 = vsel %vm1078_vm12, %v1180_v51, %v331_v36  ;;  %vm1081_vm13 = vcmp.lt.s32.totalorder %v1446_v59, 2162583142  ;;  %v798_v35 = vmul.u32 2221713035, %v750_v49 }
 0x111   : > { %1276 = vst [vmem:[%s1897_s12 + $0x160] sm:$0xff] %v1228_v32  ;;  %v1229_v43 = vsel %vm1081_vm13, %v1181_v56, %v332_v29  ;;  %v799_v26 = vmul.u32 2221713035, %v751_v60 }
 0x112   : > { %1277 = vst [vmem:[%s1897_s12 + $0x168] sm:$0xff] %v1229_v43  ;;  %v846_v61 = vshrl.u32 %v798_v35, 16 }
 0x113   : > { %v847_v62 = vshrl.u32 %v799_v26, 16 }
 0x114   : > { %v894_v63 = vxor.u32 %v846_v61, %v798_v35 }
 0x115   : > { %v895_v7 = vxor.u32 %v847_v62, %v799_v26 }
 0x116   : > { %v942_v8 = vshrl.u32 %v894_v63, 8 }
 0x117   : > { %v943_v11 = vshrl.u32 %v895_v7, 8 }
 0x118   : > { %v1447_v15 = vxor.u32 2147483648, %v942_v8 }
 0x119   : > { %v1448_v22 = vxor.u32 2147483648, %v943_v11 }
 0x11a   : > { %vm1084_vm14 = vcmp.lt.s32.totalorder %v1447_v15, 2162583142 }
 0x11b   : > { %v1230_v23 = vsel %vm1084_vm14, %v1182_v10, %v333_v1  ;;  %vm1087_vm15 = vcmp.lt.s32.totalorder %v1448_v22, 2162583142 }
 0x11c   : > { %1278 = vst [vmem:[%s1897_s12 + $0x170] sm:$0xff] %v1230_v23  ;;  %v1231_v25 = vsel %vm1087_vm15, %v1183_v18, %v334_v6 }
 0x11d   : > { %1279 = vst [vmem:[%s1897_s12 + $0x178] sm:$0xff] %v1231_v25 }
 0x11e   : > { %1607 = shalt.err (!%p1604_p5)
}
 0x11f   : > { %s1654_s26 = smov 256   ;;  %s1655_s29 = smov 16  }
 0x120   : > { %1469 = dma.vmem_to_hbm [thread:$0]  (%p1725_p11), %s1295_s0, 6144, %s1297_s8, %s1281_s9, %s1654_s26, %s1654_s26, %s1655_s29  }
 0x121 PF: > { %s1311_s30 = sand.u32 1, %s1638_s14   ;;  %p1479_p7 = pnand %p1395_p9, %p1729_p12 }
 0x122   : > { %s1312_s4 = scalar_lea.sflag [#allocation5], %s1311_s30 }
 0x123   : > { %p1480_p8 = pneg %p1479_p7 }
 0x125   : > { %1633 = dma.done.wait (%p1480_p8), %s1312_s4, 6144  }
 0x126   : > { %1635 = vsyncadd (%p1480_p8), %s1312_s4, 4294961152  ;;  %p20_p10 = scmp.ge.s32.totalorder %s1704_s19, 4   ;;  %s2260_s14 = smov %s1642_s15 }
 0x127   : > { %s2261_s15 = smov %s1646_s16  ;;  %s2262_s16 = smov %s1716_s22 }
 0x128   : > { %s2263_s17 = smov %s1704_s19  ;;  %22 = sbr.rel (!%p20_p10) target bundleno = 9 (0x9), region = 90 }
 0x12d   :  { %1318 = vsyncpa [#allocation4], 1 }
 0x12e   :  { %1320 = vsyncpa [#allocation4 + $0x1], 1 }
 0x12f   :  { %1321 = vsyncpa [#allocation7], 1 }
 0x130   :  { %1323 = vsyncpa [#allocation7 + $0x1], 1 }
 0x131   :  { %1324 = vsyncpa [#allocation5], 1 }
 0x132   :  { %1326 = vsyncpa [#allocation5 + $0x1], 1 }

</bundles_post_ra>
